<compile_context>
chip_gen: v6e
topology: v6e:2x2x1
jax: 0.10.0
libtpu: 0.0.40
codegen_flags: <defaults>
</compile_context>

<pallas_src>
import functools

import jax
import jax.numpy as jnp
from jax.experimental import pallas as pl
from jax.experimental.pallas import tpu as pltpu


def _round_up(x, m):
    return ((x + m - 1) // m) * m


def _embedding_char_kernel(cu_ref, we_ref, tconv_ref, bconv_ref, wproj_ref,
                           wt_ref, bt_ref, wg_ref, bg_ref, out_ref,
                           *, wout, n_layers, hp):
    # cu_ref   : (TN, W*Cc)  bf16   compact char embeddings (one row per token)
    # we_ref   : (TN, Dw)    bf16   word embeddings
    # tconv_ref: (W*Cc, Wout*Hp) f32   banded/Toeplitz conv weight (zero-padded lanes)
    # bconv_ref: (1, Hp) f32
    # wproj_ref: (Dw, Hp) f32
    # wt_ref/wg_ref: (L, 2, Hp, 2*Hp) f32   highway weights, pre-split by input half
    # bt_ref/bg_ref: (L, 1, 2*Hp)     f32
    # out_ref  : (TN, 2*Hp) f32   char half at lanes [0:Hp), word half at [Hp:2Hp)
    chars = cu_ref[...].astype(jnp.float32)          # cheap VPU cast, bf16 only on HBM
    words = we_ref[...].astype(jnp.float32)

    # --- char path: whole conv as a single 128-deep MXU matmul ---
    conv = jnp.dot(chars, tconv_ref[...],
                   preferred_element_type=jnp.float32)        # (TN, Wout*Hp)

    # max-pool over window positions: 128-lane-aligned (vreg-granular) slices
    char_h = conv[:, 0:hp]
    for p in range(1, wout):                                   # static unroll, wout small
        char_h = jnp.maximum(char_h, conv[:, p * hp:(p + 1) * hp])
    char_h = jnp.maximum(char_h + bconv_ref[...], 0.0)         # bias + ReLU once

    # --- word path: bias-free projection ---
    word_h = jnp.dot(words, wproj_ref[...],
                     preferred_element_type=jnp.float32)       # (TN, Hp)

    # --- highway encoder on the two 128-lane halves (no concat) ---
    x_lo, x_hi = char_h, word_h
    for l in range(n_layers):                                  # static unroll (L=2)
        zt = (jnp.dot(x_lo, wt_ref[l, 0], preferred_element_type=jnp.float32)
              + jnp.dot(x_hi, wt_ref[l, 1], preferred_element_type=jnp.float32)
              + bt_ref[l])
        zg = (jnp.dot(x_lo, wg_ref[l, 0], preferred_element_type=jnp.float32)
              + jnp.dot(x_hi, wg_ref[l, 1], preferred_element_type=jnp.float32)
              + bg_ref[l])
        t = jnp.maximum(zt, 0.0)
        g = pl.reciprocal(1.0 + jnp.exp(-zg), approx=True)     # sigmoid on EUP
        # x = g*t + (1-g)*x  ==  x + g*(t - x); split into 128-lane halves
        x_lo = x_lo + g[:, :hp] * (t[:, :hp] - x_lo)
        x_hi = x_hi + g[:, hp:] * (t[:, hp:] - x_hi)

    out_ref[:, :hp] = x_lo.astype(out_ref.dtype)
    out_ref[:, hp:] = x_hi.astype(out_ref.dtype)


def embedding_char_forward(w_idxs, c_idxs, params):
    """w_idxs: (B,S) int32, c_idxs: (B,S,W) int32 -> (B, S, 2*hidden) float32."""
    word_vectors = params["word_vectors"]          # (Vw, Dw)
    char_vectors = params["char_vectors"]          # (Vc, Cc)
    w_conv = params["w_conv"]                      # (K, Cc, H)
    b_conv = params["b_conv"]                      # (H,)
    w_proj = params["w_proj"]                      # (Dw, H)
    w_t, b_t = params["w_t"], params["b_t"]        # (L, 2H, 2H), (L, 2H)
    w_g, b_g = params["w_g"], params["b_g"]        # (L, 2H, 2H), (L, 2H)

    B, S = w_idxs.shape
    W = c_idxs.shape[-1]
    K, Cc, H = w_conv.shape
    Dw = word_vectors.shape[1]
    L = w_t.shape[0]
    Wout = W - K + 1
    N = B * S

    Hp = _round_up(H, 128)                         # lane-dense hidden size
    D2p = 2 * Hp

    # --- embedding gathers (data-dependent) kept in plain JAX, streamed in bf16 ---
    char_emb = jnp.take(char_vectors.astype(jnp.bfloat16),
                        c_idxs.reshape(-1), axis=0)            # (B*S*W, Cc)
    word_emb = jnp.take(word_vectors.astype(jnp.bfloat16),
                        w_idxs.reshape(-1), axis=0)            # (B*S, Dw)
    cu = char_emb.reshape(N, W * Cc)                           # compact: no unfold
    we = word_emb.reshape(N, Dw)

    # --- token-axis tiling: >=2 grid steps when possible (v7x megacore), TN<=1024 ---
    N8 = _round_up(N, 8)
    TN = min(1024, max(8, _round_up(pl.cdiv(N8, 2), 8)))
    Npad = _round_up(N, TN)
    if Npad != N:
        cu = jnp.pad(cu, ((0, Npad - N), (0, 0)))
        we = jnp.pad(we, ((0, Npad - N), (0, 0)))

    # --- banded/Toeplitz conv weight: (W*Cc, Wout*Hp), one matmul does all windows ---
    wflat = w_conv.reshape(K * Cc, H).astype(jnp.float32)
    tconv = jnp.zeros((W * Cc, Wout * Hp), jnp.float32)
    for p in range(Wout):                          # column blocks are disjoint
        tconv = tconv.at[p * Cc:(p + K) * Cc, p * Hp:p * Hp + H].set(wflat)

    bconv_p = jnp.zeros((1, Hp), jnp.float32).at[0, :H].set(b_conv.astype(jnp.float32))
    wproj_p = jnp.zeros((Dw, Hp), jnp.float32).at[:, :H].set(w_proj.astype(jnp.float32))

    # --- highway weights: embed (2H,2H) into lane-dense, pre-split by input half ---
    def embed_hwy_w(w):
        w = w.astype(jnp.float32)
        out = jnp.zeros((L, 2, Hp, D2p), jnp.float32)
        out = out.at[:, 0, :H, :H].set(w[:, :H, :H])             # char-in -> char-out
        out = out.at[:, 0, :H, Hp:Hp + H].set(w[:, :H, H:])      # char-in -> word-out
        out = out.at[:, 1, :H, :H].set(w[:, H:, :H])             # word-in -> char-out
        out = out.at[:, 1, :H, Hp:Hp + H].set(w[:, H:, H:])      # word-in -> word-out
        return out

    def embed_hwy_b(b):
        b = b.astype(jnp.float32)
        out = jnp.zeros((L, 1, D2p), jnp.float32)
        out = out.at[:, 0, :H].set(b[:, :H])
        out = out.at[:, 0, Hp:Hp + H].set(b[:, H:])
        return out

    wt_p, wg_p = embed_hwy_w(w_t), embed_hwy_w(w_g)
    bt_p, bg_p = embed_hwy_b(b_t), embed_hwy_b(b_g)

    kernel = functools.partial(_embedding_char_kernel, wout=Wout, n_layers=L, hp=Hp)

    flops = N * (2 * (W * Cc) * (Wout * Hp) + 2 * Dw * Hp + L * 4 * 2 * Hp * D2p)
    transcendentals = N * L * D2p
    bytes_accessed = int(2 * (cu.size + we.size)            # bf16 token streams
                         + 4 * Npad * D2p                    # f32 output
                         + 4 * (tconv.size + wproj_p.size + wt_p.size + wg_p.size
                                + bconv_p.size + bt_p.size + bg_p.size))

    out = pl.pallas_call(
        kernel,
        out_shape=jax.ShapeDtypeStruct((Npad, D2p), jnp.float32),
        grid=(Npad // TN,),
        in_specs=[
            pl.BlockSpec((TN, W * Cc), lambda i: (i, 0)),        # char emb (tiled, bf16)
            pl.BlockSpec((TN, Dw), lambda i: (i, 0)),            # word emb (tiled, bf16)
            pl.BlockSpec((W * Cc, Wout * Hp), lambda i: (0, 0)),  # Toeplitz conv W (resident)
            pl.BlockSpec((1, Hp), lambda i: (0, 0)),              # conv bias
            pl.BlockSpec((Dw, Hp), lambda i: (0, 0)),             # proj weight
            pl.BlockSpec((L, 2, Hp, D2p), lambda i: (0, 0, 0, 0)),  # highway transform W
            pl.BlockSpec((L, 1, D2p), lambda i: (0, 0, 0)),         # highway transform b
            pl.BlockSpec((L, 2, Hp, D2p), lambda i: (0, 0, 0, 0)),  # highway gate W
            pl.BlockSpec((L, 1, D2p), lambda i: (0, 0, 0)),         # highway gate b
        ],
        out_specs=pl.BlockSpec((TN, D2p), lambda i: (i, 0)),
        compiler_params=pltpu.CompilerParams(
            dimension_semantics=("parallel",),
            vmem_limit_bytes=48 * 1024 * 1024,
        ),
        cost_estimate=pl.CostEstimate(
            flops=flops, transcendentals=transcendentals, bytes_accessed=bytes_accessed),
    )(cu, we, tconv, bconv_p, wproj_p, wt_p, bt_p, wg_p, bg_p)

    # strip row padding + pick out the real lanes of each half, then concat outside
    out = out[:N]
    emb = jnp.concatenate([out[:, :H], out[:, Hp:Hp + H]], axis=-1)   # (N, 2H)
    return emb.reshape(B, S, 2 * H)


def embedding_char_reference(w_idxs, c_idxs, params):
    """Pure-JAX f32 mirror of the PyTorch forward (eval mode)."""
    char_emb = params["char_vectors"][c_idxs]                 # (B,S,W,Cc)
    word_emb = params["word_vectors"][w_idxs]                 # (B,S,Dw)
    K, Cc, H = params["w_conv"].shape
    W = c_idxs.shape[-1]
    Wout = W - K + 1
    conv = sum(jnp.einsum("bswc,ch->bswh", char_emb[:, :, k:k + Wout, :],
                          params["w_conv"][k]) for k in range(K)) + params["b_conv"]
    emb_char = jnp.max(jnp.maximum(conv, 0.0), axis=2)        # ReLU then max-pool over W
    emb_word = jnp.einsum("bsd,dh->bsh", word_emb, params["w_proj"])
    x = jnp.concatenate([emb_char, emb_word], axis=-1)        # (B,S,2H)
    for l in range(params["w_t"].shape[0]):
        t = jnp.maximum(x @ params["w_t"][l] + params["b_t"][l], 0.0)
        g = 1.0 / (1.0 + jnp.exp(-(x @ params["w_g"][l] + params["b_g"][l])))
        x = g * t + (1.0 - g) * x
    return x


if __name__ == "__main__":
    key = jax.random.PRNGKey(0)
    B, S, W = 2, 8, 16        # batch, seq len, max chars per word
    Vw, Dw = 100, 64          # word vocab size, word-vector dim
    Vc, Cc = 60, 8            # char vocab size, char-vector dim
    H, K, L = 32, 5, 2        # hidden size, char conv kernel width, highway layers

    keys = jax.random.split(key, 11)
    params = {
        "word_vectors": jax.random.normal(keys[0], (Vw, Dw), jnp.float32) * 0.1,
        "char_vectors": jax.random.normal(keys[1], (Vc, Cc), jnp.float32) * 0.1,
        "w_conv": jax.random.normal(keys[2], (K, Cc, H), jnp.float32) * 0.1,
        "b_conv": jax.random.normal(keys[3], (H,), jnp.float32) * 0.1,
        "w_proj": jax.random.normal(keys[4], (Dw, H), jnp.float32) * 0.1,
        "w_t": jax.random.normal(keys[5], (L, 2 * H, 2 * H), jnp.float32) * 0.1,
        "b_t": jax.random.normal(keys[6], (L, 2 * H), jnp.float32) * 0.1,
        "w_g": jax.random.normal(keys[7], (L, 2 * H, 2 * H), jnp.float32) * 0.1,
        "b_g": jax.random.normal(keys[8], (L, 2 * H), jnp.float32) * 0.1,
    }
    w_idxs = jax.random.randint(keys[9], (B, S), 0, Vw)
    c_idxs = jax.random.randint(keys[10], (B, S, W), 0, Vc)

    out = embedding_char_forward(w_idxs, c_idxs, params)
    out = jax.block_until_ready(out)

    ref = embedding_char_reference(w_idxs, c_idxs, params)

    assert out.shape == (B, S, 2 * H), out.shape
    # bf16 streaming of the gathered embeddings + approx-reciprocal sigmoid -> compare
    # against the f32 reference with a slightly relaxed (but still tight) tolerance.
    assert jnp.allclose(out, ref, atol=5e-3, rtol=5e-3), float(jnp.max(jnp.abs(out - ref)))

    print("KERNEL_OK")
</pallas_src>

<mosaic_0001>
module attributes {stable_mosaic.version = 11 : i64} {
  func.func @_embedding_char_kernel(%arg0: i32, %arg1: memref<8x128xbf16, #tpu.memory_space<vmem>>, %arg2: memref<8x64xbf16, #tpu.memory_space<vmem>>, %arg3: memref<128x1536xf32, #tpu.memory_space<vmem>>, %arg4: memref<1x128xf32, #tpu.memory_space<vmem>>, %arg5: memref<64x128xf32, #tpu.memory_space<vmem>>, %arg6: memref<2x2x128x256xf32, #tpu.memory_space<vmem>>, %arg7: memref<2x1x256xf32, #tpu.memory_space<vmem>>, %arg8: memref<2x2x128x256xf32, #tpu.memory_space<vmem>>, %arg9: memref<2x1x256xf32, #tpu.memory_space<vmem>>, %arg10: memref<8x256xf32, #tpu.memory_space<vmem>>) attributes {dimension_semantics = [#tpu.dimension_semantics<parallel>], iteration_bounds = array<i64: 2>, scalar_prefetch = 0 : i64, scratch_operands = 0 : i64, tpu.core_type = #tpu.core_type<tc>, window_params = [{transform_indices = @transform_0, window_bounds = array<i64: 8, 128>}, {transform_indices = @transform_1, window_bounds = array<i64: 8, 64>}, {pipeline_mode = #tpu.pipeline_mode<synchronous>, transform_indices = @transform_2, window_bounds = array<i64: 128, 1536>}, {pipeline_mode = #tpu.pipeline_mode<synchronous>, transform_indices = @transform_3, window_bounds = array<i64: 1, 128>}, {pipeline_mode = #tpu.pipeline_mode<synchronous>, transform_indices = @transform_4, window_bounds = array<i64: 64, 128>}, {pipeline_mode = #tpu.pipeline_mode<synchronous>, transform_indices = @transform_5, window_bounds = array<i64: 2, 2, 128, 256>}, {pipeline_mode = #tpu.pipeline_mode<synchronous>, transform_indices = @transform_6, window_bounds = array<i64: 2, 1, 256>}, {pipeline_mode = #tpu.pipeline_mode<synchronous>, transform_indices = @transform_7, window_bounds = array<i64: 2, 2, 128, 256>}, {pipeline_mode = #tpu.pipeline_mode<synchronous>, transform_indices = @transform_8, window_bounds = array<i64: 2, 1, 256>}, {transform_indices = @transform_9, window_bounds = array<i64: 8, 256>}]} {
    %c0 = arith.constant 0 : index
    %c0_0 = arith.constant 0 : index
    %0 = vector.load %arg1[%c0, %c0_0] : memref<8x128xbf16, #tpu.memory_space<vmem>>, vector<8x128xbf16>
    %1 = arith.extf %0 : vector<8x128xbf16> to vector<8x128xf32>
    %c0_1 = arith.constant 0 : index
    %c0_2 = arith.constant 0 : index
    %2 = vector.load %arg2[%c0_1, %c0_2] : memref<8x64xbf16, #tpu.memory_space<vmem>>, vector<8x64xbf16>
    %3 = arith.extf %2 : vector<8x64xbf16> to vector<8x64xf32>
    %c0_3 = arith.constant 0 : index
    %c0_4 = arith.constant 0 : index
    %4 = vector.load %arg3[%c0_3, %c0_4] : memref<128x1536xf32, #tpu.memory_space<vmem>>, vector<128x1536xf32>
    %cst = arith.constant dense<0.000000e+00> : vector<8x1536xf32>
    %5 = tpu.matmul %1, %4, %cst {dimension_numbers = #tpu.dot_dimension_numbers<[1], [0], [0], [1], [0, 0, 1, 1], [], []>} : vector<8x128xf32>, vector<128x1536xf32>, vector<8x1536xf32> -> vector<8x1536xf32>
    %6 = vector.extract_strided_slice %5 {offsets = [0, 0], sizes = [8, 128], strides = [1, 1]} : vector<8x1536xf32> to vector<8x128xf32>
    %7 = vector.extract_strided_slice %5 {offsets = [0, 128], sizes = [8, 128], strides = [1, 1]} : vector<8x1536xf32> to vector<8x128xf32>
    %8 = arith.maximumf %6, %7 : vector<8x128xf32>
    %9 = vector.extract_strided_slice %5 {offsets = [0, 256], sizes = [8, 128], strides = [1, 1]} : vector<8x1536xf32> to vector<8x128xf32>
    %10 = arith.maximumf %8, %9 : vector<8x128xf32>
    %11 = vector.extract_strided_slice %5 {offsets = [0, 384], sizes = [8, 128], strides = [1, 1]} : vector<8x1536xf32> to vector<8x128xf32>
    %12 = arith.maximumf %10, %11 : vector<8x128xf32>
    %13 = vector.extract_strided_slice %5 {offsets = [0, 512], sizes = [8, 128], strides = [1, 1]} : vector<8x1536xf32> to vector<8x128xf32>
    %14 = arith.maximumf %12, %13 : vector<8x128xf32>
    %15 = vector.extract_strided_slice %5 {offsets = [0, 640], sizes = [8, 128], strides = [1, 1]} : vector<8x1536xf32> to vector<8x128xf32>
    %16 = arith.maximumf %14, %15 : vector<8x128xf32>
    %17 = vector.extract_strided_slice %5 {offsets = [0, 768], sizes = [8, 128], strides = [1, 1]} : vector<8x1536xf32> to vector<8x128xf32>
    %18 = arith.maximumf %16, %17 : vector<8x128xf32>
    %19 = vector.extract_strided_slice %5 {offsets = [0, 896], sizes = [8, 128], strides = [1, 1]} : vector<8x1536xf32> to vector<8x128xf32>
    %20 = arith.maximumf %18, %19 : vector<8x128xf32>
    %21 = vector.extract_strided_slice %5 {offsets = [0, 1024], sizes = [8, 128], strides = [1, 1]} : vector<8x1536xf32> to vector<8x128xf32>
    %22 = arith.maximumf %20, %21 : vector<8x128xf32>
    %23 = vector.extract_strided_slice %5 {offsets = [0, 1152], sizes = [8, 128], strides = [1, 1]} : vector<8x1536xf32> to vector<8x128xf32>
    %24 = arith.maximumf %22, %23 : vector<8x128xf32>
    %25 = vector.extract_strided_slice %5 {offsets = [0, 1280], sizes = [8, 128], strides = [1, 1]} : vector<8x1536xf32> to vector<8x128xf32>
    %26 = arith.maximumf %24, %25 : vector<8x128xf32>
    %27 = vector.extract_strided_slice %5 {offsets = [0, 1408], sizes = [8, 128], strides = [1, 1]} : vector<8x1536xf32> to vector<8x128xf32>
    %28 = arith.maximumf %26, %27 : vector<8x128xf32>
    %c0_5 = arith.constant 0 : index
    %c0_6 = arith.constant 0 : index
    %29 = vector.load %arg4[%c0_5, %c0_6] : memref<1x128xf32, #tpu.memory_space<vmem>>, vector<1x128xf32>
    %30 = vector.broadcast %29 : vector<1x128xf32> to vector<8x128xf32>
    %31 = arith.addf %28, %30 : vector<8x128xf32>
    %cst_7 = arith.constant 0.000000e+00 : f32
    %32 = vector.broadcast %cst_7 : f32 to vector<8x128xf32>
    %33 = arith.maximumf %31, %32 : vector<8x128xf32>
    %c0_8 = arith.constant 0 : index
    %c0_9 = arith.constant 0 : index
    %34 = vector.load %arg5[%c0_8, %c0_9] : memref<64x128xf32, #tpu.memory_space<vmem>>, vector<64x128xf32>
    %cst_10 = arith.constant dense<0.000000e+00> : vector<8x128xf32>
    %35 = tpu.matmul %3, %34, %cst_10 {dimension_numbers = #tpu.dot_dimension_numbers<[1], [0], [0], [1], [0, 0, 1, 1], [], []>} : vector<8x64xf32>, vector<64x128xf32>, vector<8x128xf32> -> vector<8x128xf32>
    %c0_11 = arith.constant 0 : index
    %c0_12 = arith.constant 0 : index
    %c0_13 = arith.constant 0 : index
    %c0_14 = arith.constant 0 : index
    %36 = vector.load %arg6[%c0_11, %c0_12, %c0_13, %c0_14] : memref<2x2x128x256xf32, #tpu.memory_space<vmem>>, vector<1x1x128x256xf32>
    %37 = vector.shape_cast %36 : vector<1x1x128x256xf32> to vector<128x256xf32>
    %cst_15 = arith.constant dense<0.000000e+00> : vector<8x256xf32>
    %38 = tpu.matmul %33, %37, %cst_15 {dimension_numbers = #tpu.dot_dimension_numbers<[1], [0], [0], [1], [0, 0, 1, 1], [], []>} : vector<8x128xf32>, vector<128x256xf32>, vector<8x256xf32> -> vector<8x256xf32>
    %c0_16 = arith.constant 0 : index
    %c1 = arith.constant 1 : index
    %c0_17 = arith.constant 0 : index
    %c0_18 = arith.constant 0 : index
    %39 = vector.load %arg6[%c0_16, %c1, %c0_17, %c0_18] : memref<2x2x128x256xf32, #tpu.memory_space<vmem>>, vector<1x1x128x256xf32>
    %40 = vector.shape_cast %39 : vector<1x1x128x256xf32> to vector<128x256xf32>
    %cst_19 = arith.constant dense<0.000000e+00> : vector<8x256xf32>
    %41 = tpu.matmul %35, %40, %cst_19 {dimension_numbers = #tpu.dot_dimension_numbers<[1], [0], [0], [1], [0, 0, 1, 1], [], []>} : vector<8x128xf32>, vector<128x256xf32>, vector<8x256xf32> -> vector<8x256xf32>
    %42 = arith.addf %38, %41 : vector<8x256xf32>
    %c0_20 = arith.constant 0 : index
    %c0_21 = arith.constant 0 : index
    %c0_22 = arith.constant 0 : index
    %43 = vector.load %arg7[%c0_20, %c0_21, %c0_22] : memref<2x1x256xf32, #tpu.memory_space<vmem>>, vector<1x1x256xf32>
    %44 = vector.shape_cast %43 : vector<1x1x256xf32> to vector<1x256xf32>
    %45 = vector.broadcast %44 : vector<1x256xf32> to vector<8x256xf32>
    %46 = arith.addf %42, %45 : vector<8x256xf32>
    %c0_23 = arith.constant 0 : index
    %c0_24 = arith.constant 0 : index
    %c0_25 = arith.constant 0 : index
    %c0_26 = arith.constant 0 : index
    %47 = vector.load %arg8[%c0_23, %c0_24, %c0_25, %c0_26] : memref<2x2x128x256xf32, #tpu.memory_space<vmem>>, vector<1x1x128x256xf32>
    %48 = vector.shape_cast %47 : vector<1x1x128x256xf32> to vector<128x256xf32>
    %cst_27 = arith.constant dense<0.000000e+00> : vector<8x256xf32>
    %49 = tpu.matmul %33, %48, %cst_27 {dimension_numbers = #tpu.dot_dimension_numbers<[1], [0], [0], [1], [0, 0, 1, 1], [], []>} : vector<8x128xf32>, vector<128x256xf32>, vector<8x256xf32> -> vector<8x256xf32>
    %c0_28 = arith.constant 0 : index
    %c1_29 = arith.constant 1 : index
    %c0_30 = arith.constant 0 : index
    %c0_31 = arith.constant 0 : index
    %50 = vector.load %arg8[%c0_28, %c1_29, %c0_30, %c0_31] : memref<2x2x128x256xf32, #tpu.memory_space<vmem>>, vector<1x1x128x256xf32>
    %51 = vector.shape_cast %50 : vector<1x1x128x256xf32> to vector<128x256xf32>
    %cst_32 = arith.constant dense<0.000000e+00> : vector<8x256xf32>
    %52 = tpu.matmul %35, %51, %cst_32 {dimension_numbers = #tpu.dot_dimension_numbers<[1], [0], [0], [1], [0, 0, 1, 1], [], []>} : vector<8x128xf32>, vector<128x256xf32>, vector<8x256xf32> -> vector<8x256xf32>
    %53 = arith.addf %49, %52 : vector<8x256xf32>
    %c0_33 = arith.constant 0 : index
    %c0_34 = arith.constant 0 : index
    %c0_35 = arith.constant 0 : index
    %54 = vector.load %arg9[%c0_33, %c0_34, %c0_35] : memref<2x1x256xf32, #tpu.memory_space<vmem>>, vector<1x1x256xf32>
    %55 = vector.shape_cast %54 : vector<1x1x256xf32> to vector<1x256xf32>
    %56 = vector.broadcast %55 : vector<1x256xf32> to vector<8x256xf32>
    %57 = arith.addf %53, %56 : vector<8x256xf32>
    %cst_36 = arith.constant 0.000000e+00 : f32
    %58 = vector.broadcast %cst_36 : f32 to vector<8x256xf32>
    %59 = arith.maximumf %46, %58 : vector<8x256xf32>
    %cst_37 = arith.constant 0.000000e+00 : f32
    %60 = vector.broadcast %cst_37 : f32 to vector<8x256xf32>
    %61 = arith.subf %60, %57 : vector<8x256xf32>
    %62 = math.exp %61 : vector<8x256xf32>
    %cst_38 = arith.constant 1.000000e+00 : f32
    %63 = vector.broadcast %cst_38 : f32 to vector<8x256xf32>
    %64 = arith.addf %63, %62 : vector<8x256xf32>
    %65 = tpu.reciprocal %64 {approx = true} : vector<8x256xf32> -> vector<8x256xf32>
    %66 = vector.extract_strided_slice %65 {offsets = [0, 0], sizes = [8, 128], strides = [1, 1]} : vector<8x256xf32> to vector<8x128xf32>
    %67 = vector.extract_strided_slice %59 {offsets = [0, 0], sizes = [8, 128], strides = [1, 1]} : vector<8x256xf32> to vector<8x128xf32>
    %68 = arith.subf %67, %33 : vector<8x128xf32>
    %69 = arith.mulf %66, %68 : vector<8x128xf32>
    %70 = arith.addf %33, %69 : vector<8x128xf32>
    %71 = vector.extract_strided_slice %65 {offsets = [0, 128], sizes = [8, 128], strides = [1, 1]} : vector<8x256xf32> to vector<8x128xf32>
    %72 = vector.extract_strided_slice %59 {offsets = [0, 128], sizes = [8, 128], strides = [1, 1]} : vector<8x256xf32> to vector<8x128xf32>
    %73 = arith.subf %72, %35 : vector<8x128xf32>
    %74 = arith.mulf %71, %73 : vector<8x128xf32>
    %75 = arith.addf %35, %74 : vector<8x128xf32>
    %c1_39 = arith.constant 1 : index
    %c0_40 = arith.constant 0 : index
    %c0_41 = arith.constant 0 : index
    %c0_42 = arith.constant 0 : index
    %76 = vector.load %arg6[%c1_39, %c0_40, %c0_41, %c0_42] : memref<2x2x128x256xf32, #tpu.memory_space<vmem>>, vector<1x1x128x256xf32>
    %77 = vector.shape_cast %76 : vector<1x1x128x256xf32> to vector<128x256xf32>
    %cst_43 = arith.constant dense<0.000000e+00> : vector<8x256xf32>
    %78 = tpu.matmul %70, %77, %cst_43 {dimension_numbers = #tpu.dot_dimension_numbers<[1], [0], [0], [1], [0, 0, 1, 1], [], []>} : vector<8x128xf32>, vector<128x256xf32>, vector<8x256xf32> -> vector<8x256xf32>
    %c1_44 = arith.constant 1 : index
    %c1_45 = arith.constant 1 : index
    %c0_46 = arith.constant 0 : index
    %c0_47 = arith.constant 0 : index
    %79 = vector.load %arg6[%c1_44, %c1_45, %c0_46, %c0_47] : memref<2x2x128x256xf32, #tpu.memory_space<vmem>>, vector<1x1x128x256xf32>
    %80 = vector.shape_cast %79 : vector<1x1x128x256xf32> to vector<128x256xf32>
    %cst_48 = arith.constant dense<0.000000e+00> : vector<8x256xf32>
    %81 = tpu.matmul %75, %80, %cst_48 {dimension_numbers = #tpu.dot_dimension_numbers<[1], [0], [0], [1], [0, 0, 1, 1], [], []>} : vector<8x128xf32>, vector<128x256xf32>, vector<8x256xf32> -> vector<8x256xf32>
    %82 = arith.addf %78, %81 : vector<8x256xf32>
    %c1_49 = arith.constant 1 : index
    %c0_50 = arith.constant 0 : index
    %c0_51 = arith.constant 0 : index
    %83 = vector.load %arg7[%c1_49, %c0_50, %c0_51] : memref<2x1x256xf32, #tpu.memory_space<vmem>>, vector<1x1x256xf32>
    %84 = vector.shape_cast %83 : vector<1x1x256xf32> to vector<1x256xf32>
    %85 = vector.broadcast %84 : vector<1x256xf32> to vector<8x256xf32>
    %86 = arith.addf %82, %85 : vector<8x256xf32>
    %c1_52 = arith.constant 1 : index
    %c0_53 = arith.constant 0 : index
    %c0_54 = arith.constant 0 : index
    %c0_55 = arith.constant 0 : index
    %87 = vector.load %arg8[%c1_52, %c0_53, %c0_54, %c0_55] : memref<2x2x128x256xf32, #tpu.memory_space<vmem>>, vector<1x1x128x256xf32>
    %88 = vector.shape_cast %87 : vector<1x1x128x256xf32> to vector<128x256xf32>
    %cst_56 = arith.constant dense<0.000000e+00> : vector<8x256xf32>
    %89 = tpu.matmul %70, %88, %cst_56 {dimension_numbers = #tpu.dot_dimension_numbers<[1], [0], [0], [1], [0, 0, 1, 1], [], []>} : vector<8x128xf32>, vector<128x256xf32>, vector<8x256xf32> -> vector<8x256xf32>
    %c1_57 = arith.constant 1 : index
    %c1_58 = arith.constant 1 : index
    %c0_59 = arith.constant 0 : index
    %c0_60 = arith.constant 0 : index
    %90 = vector.load %arg8[%c1_57, %c1_58, %c0_59, %c0_60] : memref<2x2x128x256xf32, #tpu.memory_space<vmem>>, vector<1x1x128x256xf32>
    %91 = vector.shape_cast %90 : vector<1x1x128x256xf32> to vector<128x256xf32>
    %cst_61 = arith.constant dense<0.000000e+00> : vector<8x256xf32>
    %92 = tpu.matmul %75, %91, %cst_61 {dimension_numbers = #tpu.dot_dimension_numbers<[1], [0], [0], [1], [0, 0, 1, 1], [], []>} : vector<8x128xf32>, vector<128x256xf32>, vector<8x256xf32> -> vector<8x256xf32>
    %93 = arith.addf %89, %92 : vector<8x256xf32>
    %c1_62 = arith.constant 1 : index
    %c0_63 = arith.constant 0 : index
    %c0_64 = arith.constant 0 : index
    %94 = vector.load %arg9[%c1_62, %c0_63, %c0_64] : memref<2x1x256xf32, #tpu.memory_space<vmem>>, vector<1x1x256xf32>
    %95 = vector.shape_cast %94 : vector<1x1x256xf32> to vector<1x256xf32>
    %96 = vector.broadcast %95 : vector<1x256xf32> to vector<8x256xf32>
    %97 = arith.addf %93, %96 : vector<8x256xf32>
    %cst_65 = arith.constant 0.000000e+00 : f32
    %98 = vector.broadcast %cst_65 : f32 to vector<8x256xf32>
    %99 = arith.maximumf %86, %98 : vector<8x256xf32>
    %cst_66 = arith.constant 0.000000e+00 : f32
    %100 = vector.broadcast %cst_66 : f32 to vector<8x256xf32>
    %101 = arith.subf %100, %97 : vector<8x256xf32>
    %102 = math.exp %101 : vector<8x256xf32>
    %cst_67 = arith.constant 1.000000e+00 : f32
    %103 = vector.broadcast %cst_67 : f32 to vector<8x256xf32>
    %104 = arith.addf %103, %102 : vector<8x256xf32>
    %105 = tpu.reciprocal %104 {approx = true} : vector<8x256xf32> -> vector<8x256xf32>
    %106 = vector.extract_strided_slice %105 {offsets = [0, 0], sizes = [8, 128], strides = [1, 1]} : vector<8x256xf32> to vector<8x128xf32>
    %107 = vector.extract_strided_slice %99 {offsets = [0, 0], sizes = [8, 128], strides = [1, 1]} : vector<8x256xf32> to vector<8x128xf32>
    %108 = arith.subf %107, %70 : vector<8x128xf32>
    %109 = arith.mulf %106, %108 : vector<8x128xf32>
    %110 = arith.addf %70, %109 : vector<8x128xf32>
    %111 = vector.extract_strided_slice %105 {offsets = [0, 128], sizes = [8, 128], strides = [1, 1]} : vector<8x256xf32> to vector<8x128xf32>
    %112 = vector.extract_strided_slice %99 {offsets = [0, 128], sizes = [8, 128], strides = [1, 1]} : vector<8x256xf32> to vector<8x128xf32>
    %113 = arith.subf %112, %75 : vector<8x128xf32>
    %114 = arith.mulf %111, %113 : vector<8x128xf32>
    %115 = arith.addf %75, %114 : vector<8x128xf32>
    %c0_68 = arith.constant 0 : index
    %c0_69 = arith.constant 0 : index
    %116 = vector.load %arg10[%c0_68, %c0_69] : memref<8x256xf32, #tpu.memory_space<vmem>>, vector<8x128xf32>
    tpu.vector_store %arg10[%c0_68, %c0_69], %110 {strides = array<i32>} : memref<8x256xf32, #tpu.memory_space<vmem>>, vector<8x128xf32>,
    %c0_70 = arith.constant 0 : index
    %c128 = arith.constant 128 : index
    %117 = vector.load %arg10[%c0_70, %c128] : memref<8x256xf32, #tpu.memory_space<vmem>>, vector<8x128xf32>
    tpu.vector_store %arg10[%c0_70, %c128], %115 {strides = array<i32>} : memref<8x256xf32, #tpu.memory_space<vmem>>, vector<8x128xf32>,
    return
  }
  func.func @transform_0(%arg0: i32) -> (i32, i32) {
    %c0_i32 = arith.constant 0 : i32
    %c0_i32_0 = arith.constant 0 : i32
    return %arg0, %c0_i32 : i32, i32
  }
  func.func @transform_1(%arg0: i32) -> (i32, i32) {
    %c0_i32 = arith.constant 0 : i32
    %c0_i32_0 = arith.constant 0 : i32
    return %arg0, %c0_i32 : i32, i32
  }
  func.func @transform_2(%arg0: i32) -> (i32, i32) {
    %c0_i32 = arith.constant 0 : i32
    %c0_i32_0 = arith.constant 0 : i32
    %c0_i32_1 = arith.constant 0 : i32
    return %c0_i32, %c0_i32_0 : i32, i32
  }
  func.func @transform_3(%arg0: i32) -> (i32, i32) {
    %c0_i32 = arith.constant 0 : i32
    %c0_i32_0 = arith.constant 0 : i32
    %c0_i32_1 = arith.constant 0 : i32
    return %c0_i32, %c0_i32_0 : i32, i32
  }
  func.func @transform_4(%arg0: i32) -> (i32, i32) {
    %c0_i32 = arith.constant 0 : i32
    %c0_i32_0 = arith.constant 0 : i32
    %c0_i32_1 = arith.constant 0 : i32
    return %c0_i32, %c0_i32_0 : i32, i32
  }
  func.func @transform_5(%arg0: i32) -> (i32, i32, i32, i32) {
    %c0_i32 = arith.constant 0 : i32
    %c0_i32_0 = arith.constant 0 : i32
    %c0_i32_1 = arith.constant 0 : i32
    %c0_i32_2 = arith.constant 0 : i32
    %c0_i32_3 = arith.constant 0 : i32
    return %c0_i32, %c0_i32_0, %c0_i32_1, %c0_i32_2 : i32, i32, i32, i32
  }
  func.func @transform_6(%arg0: i32) -> (i32, i32, i32) {
    %c0_i32 = arith.constant 0 : i32
    %c0_i32_0 = arith.constant 0 : i32
    %c0_i32_1 = arith.constant 0 : i32
    %c0_i32_2 = arith.constant 0 : i32
    return %c0_i32, %c0_i32_0, %c0_i32_1 : i32, i32, i32
  }
  func.func @transform_7(%arg0: i32) -> (i32, i32, i32, i32) {
    %c0_i32 = arith.constant 0 : i32
    %c0_i32_0 = arith.constant 0 : i32
    %c0_i32_1 = arith.constant 0 : i32
    %c0_i32_2 = arith.constant 0 : i32
    %c0_i32_3 = arith.constant 0 : i32
    return %c0_i32, %c0_i32_0, %c0_i32_1, %c0_i32_2 : i32, i32, i32, i32
  }
  func.func @transform_8(%arg0: i32) -> (i32, i32, i32) {
    %c0_i32 = arith.constant 0 : i32
    %c0_i32_0 = arith.constant 0 : i32
    %c0_i32_1 = arith.constant 0 : i32
    %c0_i32_2 = arith.constant 0 : i32
    return %c0_i32, %c0_i32_0, %c0_i32_1 : i32, i32, i32
  }
  func.func @transform_9(%arg0: i32) -> (i32, i32) {
    %c0_i32 = arith.constant 0 : i32
    %c0_i32_0 = arith.constant 0 : i32
    return %arg0, %c0_i32 : i32, i32
  }
}

</mosaic_0001>

<bundles_post_ra>
// kernel: tpu_custom_call.1
= control target key start
LH: loop header
LB: loop body
LE: loop exit
PB: predicated region body
PF: predicated region fallthrough
CT: control target
= control target key end

     0   :  { %s3058_s0 = inlined_call_operand.hbm [shape: bf16[16,128], index: 0, kind: input, shape index: {}]   ;;  %s3059_s1 = inlined_call_operand.hbm [shape: bf16[16,64], index: 1, kind: input, shape index: {}]   ;;  %s3060_s2 = inlined_call_operand.hbm [shape: f32[128,1536], index: 2, kind: input, shape index: {}]   ;;  %s3061_s3 = inlined_call_operand.vmem [shape: f32[1,128], index: 3, kind: input, shape index: {}]   ;;  %s3062_s4 = inlined_call_operand.hbm [shape: f32[64,128], index: 4, kind: input, shape index: {}]   ;;  %s3063_s5 = inlined_call_operand.hbm [shape: f32[2,2,128,256], index: 5, kind: input, shape index: {}]   ;;  %s3064_s6 = inlined_call_operand.vmem [shape: f32[2,1,256], index: 6, kind: input, shape index: {}]   ;;  %s3065_s7 = inlined_call_operand.hbm [shape: f32[2,2,128,256], index: 7, kind: input, shape index: {}]   ;;  %s3066_s8 = inlined_call_operand.vmem [shape: f32[2,1,256], index: 8, kind: input, shape index: {}]   ;;  %s3067_s9 = inlined_call_operand.hbm [shape: f32[16,256], index: 9, kind: output, shape index: {}]  }
   0x1   :  { %3073 = sst [smem:[#allocation22_spill]] %s3060_s2 }
   0x2   :  { %3074 = sst [smem:[#allocation23_spill]] %s3062_s4 }
   0x3   :  { %3075 = sst [smem:[#allocation24_spill]] %s3063_s5 }
   0x4   :  { %3076 = sst [smem:[#allocation25_spill]] %s3065_s7 }
   0x5   :  { %14 = vsyncpa [#allocation3], 0 }
   0x6   :  { %16 = vsyncpa [#allocation3 + $0x1], 0 }
   0x7   :  { %17 = vsyncpa [#allocation6], 0 }
   0x8   :  { %19 = vsyncpa [#allocation6 + $0x1], 0 }
   0x9   :  { %20 = vsyncpa [#allocation9], 0 }
   0xa   :  { %21 = vsyncpa [#allocation12], 0 }
   0xb   :  { %22 = vsyncpa [#allocation4], 0 }
   0xc   :  { %24 = vsyncpa [#allocation4 + $0x1], 0  ;;  %s2719_s30 = smov 0   ;;  %s2721_s10 = smov 0  }
   0xd   :  { %s2723_s11 = smov 0   ;;  %s2725_s12 = smov 0  }
   0xe LB: > { %3077 = sst [smem:[#allocation20_spill]] %s2648_s11  ;;  %s2654_s13 = smov [#allocation7]   ;;  %s2652_s12 = sphi %s2725_s12, %s3105_s12   ;;  %s2648_s11 = sphi %s2723_s11, %s3102_s11   ;;  %s2644_s10 = sphi %s2721_s10, %s3104_s10   ;;  %s2640_s30 = sphi %s2719_s30, %s3103_s30  }
   0xf   : > { %s272_s14 = sshll.u32 %s2654_s13, 4  ;;  %s2740_s15 = sadd.s32 4294967295, %s2652_s12   ;;  %s273_s14 = int_to_ptr.vmem [resolvable:$true] %s272_s14 }
  0x10   : > { %p2240_p0 = scmp.ge.s32.totalorder %s2652_s12, 1  ;;  %p3069_p1 = scmp.eq.s32.totalorder %s2740_s15, 0 }
  0x11   : > { %p260_p2 = scmp.lt.s32.totalorder %s2652_s12, 3  ;;  %s2655_s17 = smov [#allocation8]  }
  0x12   : > { %s288_s18 = sshll.u32 %s2655_s17, 4  ;;  %s2656_s20 = smov [#allocation10]   ;;  %s2758_s18 = int_to_ptr.vmem [resolvable:$true] %s288_s18 }
  0x13   : > { %p2745_p3 = pnand %p2240_p0, %p260_p2  ;;  %s2760_s21 = sshll.u32 %s2656_s20, 4  ;;  %s302_s21 = int_to_ptr.vmem [resolvable:$true] %s2760_s21 }
  0x14   : > { %s2423_s22 = scalar_lea.vmem %s273_s14, 24576  ;;  %p2431_p11 = scmp.lt.s32.totalorder %s273_s14, %s273_s14 }
  0x15   : > { %s3078_s16 = scalar_select %p2745_p3, 1, 0 }
  0x16   : > { %p2318_p5 = pneg %p2745_p3  ;;  %p2424_p8 = scmp.ne.s32.totalorder %s273_s14, %s2423_s22 }
  0x17   : > { %p2432_p12 = scmp.lt.s32.totalorder %s2423_s22, %s2423_s22 }
  0x18   : > { %p2754_p6 = pnand %p2318_p5, %p3069_p1 }
  0x19   : > { %p2433_p13 = por %p2432_p12, %p2431_p11 }
  0x1a   : > { %p2414_p7 = pneg %p2754_p6 }
  0x1c   : > { %p2426_p9 = pnand %p2424_p8, %p2414_p7 }
  0x1e   : > { %p2427_p10 = pneg %p2426_p9 }
  0x20   : > { %p2434_p0 = pnand %p2433_p13, %p2427_p10 }
  0x22   : > { %2437 = shalt.err (!%p2434_p0)
}
  0x23   : > { %s2657_s23 = smov 1536   ;;  %s2658_s24 = smov 96  }
  0x24   : > { %s3080_s2 = sld [smem:[#allocation22_spill]]  ;;  %s2449_s27 = scalar_lea.vmem %s2758_s18, 1024 }
  0x25   : > { %p2450_p2 = scmp.ne.s32.totalorder %s2758_s18, %s2449_s27  ;;  %p2457_p9 = scmp.lt.s32.totalorder %s2758_s18, %s2758_s18 }
  0x26   : > { %p2458_p10 = scmp.lt.s32.totalorder %s2449_s27, %s2449_s27 }
  0x27   : > { %p2452_p5 = pnand %p2450_p2, %p2414_p7 }
  0x28   : > { %p2459_p11 = por %p2458_p10, %p2457_p9 }
  0x29   : > { %p2453_p8 = pneg %p2452_p5 }
  0x2a   : > { %2321 = dma.hbm_to_vmem [thread:$0]  (!%p2754_p6), %s3080_s2, 24576, %s273_s14, [#allocation6], %s2657_s23, %s2657_s23, %s2658_s24  }
  0x2b   : > { %p2460_p12 = pnand %p2459_p11, %p2453_p8 }
  0x2d   : > { %2463 = shalt.err (!%p2460_p12)
}
  0x2e   : > { %s2659_s28 = smov 128   ;;  %s2660_s29 = smov 8  }
  0x2f   : > { %s3081_s4 = sld [smem:[#allocation23_spill]]  ;;  %s2475_s17 = scalar_lea.vmem %s302_s21, 16384 }
  0x30   : > { %p2476_p13 = scmp.ne.s32.totalorder %s302_s21, %s2475_s17  ;;  %p2483_p5 = scmp.lt.s32.totalorder %s302_s21, %s302_s21 }
  0x31   : > { %p2484_p8 = scmp.lt.s32.totalorder %s2475_s17, %s2475_s17 }
  0x32   : > { %p2478_p0 = pnand %p2476_p13, %p2414_p7 }
  0x33   : > { %p2485_p9 = por %p2484_p8, %p2483_p5 }
  0x34   : > { %p2479_p2 = pneg %p2478_p0 }
  0x35   : > { %2324 = dma.hbm_to_vmem [thread:$0]  (!%p2754_p6), %s3081_s4, 1024, %s2758_s18, [#allocation9], %s2659_s28, %s2659_s28, %s2660_s29  }
  0x36   : > { %p2486_p10 = pnand %p2485_p9, %p2479_p2 }
  0x38   : > { %2489 = shalt.err (!%p2486_p10)
}
  0x39   : > { %s2661_s20 = smov 256   ;;  %s2662_s22 = smov 16  }
  0x3a   : > { %s3082_s5 = sld [smem:[#allocation24_spill]]  ;;  %s2663_s18 = smov [#allocation11]  }
  0x3b   : > { %s317_s25 = sshll.u32 %s2663_s18, 4  ;;  %s318_s25 = int_to_ptr.vmem [resolvable:$true] %s317_s25 }
  0x3c   : > { %s2501_s26 = scalar_lea.vmem %s318_s25, 16384  ;;  %p2509_p0 = scmp.lt.s32.totalorder %s318_s25, %s318_s25 }
  0x3d   : > { %p2502_p11 = scmp.ne.s32.totalorder %s318_s25, %s2501_s26  ;;  %p2510_p2 = scmp.lt.s32.totalorder %s2501_s26, %s2501_s26 }
  0x3f   : > { %p2504_p12 = pnand %p2502_p11, %p2414_p7  ;;  %p2511_p5 = por %p2510_p2, %p2509_p0 }
  0x40   : > { %2327 = dma.hbm_to_vmem [thread:$0]  (!%p2754_p6), %s3082_s5, 16384, %s302_s21, [#allocation9], %s2661_s20, %s2661_s20, %s2662_s22  }
  0x41   : > { %p2505_p13 = pneg %p2504_p12 }
  0x43   : > { %p2512_p8 = pnand %p2511_p5, %p2505_p13 }
  0x45   : > { %2515 = shalt.err (!%p2512_p8)
}
  0x46   : > { %s3083_s7 = sld [smem:[#allocation25_spill]]  ;;  %s2239_s21 = sadd.s32 4294967294, %s2652_s12  }
  0x47   : > { %s2804_s19 = sadd.s32 1, %s2652_s12   ;;  %s37_s13 = sadd.s32 1, %s2648_s11 }
  0x48   : > { %s34_s29 = ssub.s32 %s2652_s12, %s2804_s19  ;;  %p44_p9 = scmp.ne.s32.totalorder %s2648_s11, %s2644_s10 }
  0x49   : > { %p35_p7 = scmp.eq.s32.totalorder %s34_s29, 0  ;;  %p45_p10 = scmp.eq.s32.totalorder %s2652_s12, 0 }
  0x4a   : > { %p50_p11 = scmp.ne.s32.totalorder %s2644_s10, %s2640_s30  ;;  %p247_p13 = scmp.eq.s32.totalorder %s2740_s15, 1 }
  0x4b   : > { %s2815_s14 = scalar_select %p35_p7, %s2648_s11, %s37_s13  }
  0x4c   : > { %2330 = dma.hbm_to_vmem [thread:$0]  (!%p2754_p6), %s3083_s7, 16384, %s318_s25, [#allocation12], %s2661_s20, %s2661_s20, %s2662_s22  }
  0x4d   : > { %3084 = sst [smem:[#allocation21_spill]] %s2815_s14  ;;  %p2817_p12 = por %p45_p10, %p44_p9 }
  0x4e   : > { %p2823_p6 = por %p3069_p1, %p50_p11  ;;  %p253_p0 = scmp.eq.s32.totalorder %s2239_s21, 1 }
  0x4f   : > { %p2346_p2 = scmp.lt.s32.totalorder %s2652_s12, 2  ;;  %s334_s22 = sand.u32 1, %s2648_s11  }
  0x50   : > { %s3086_s20 = scalar_select %p2823_p6, 1, 0 }
  0x51   : > { %p2830_p5 = por %p247_p13, %p44_p9  ;;  %p2834_p8 = por %p253_p0, %p50_p11 }
  0x52   : > { %s2838_s18 = sshll.u32 %s334_s22, 2  ;;  %s2247_s25 = sshll.u32 %s2652_s12, 6 }
  0x53   : > { %s3087_s23 = scalar_select %p2830_p5, 1, 0 }
  0x54   : > { %s3088_s24 = scalar_select %p2834_p8, 1, 0 }
  0x55   : > { %s2844_s28 = scalar_lea.hbm %s3058_s0, %s2247_s25  ;;  %s338_s21 = scalar_lea.vmem [#allocation2], %s2838_s18 }
  0x56   : > { %s345_s29 = sshll.u32 %s338_s21, 4  ;;  %p2851_p7 = pnand %p2346_p2, %p2817_p12  ;;  %s2847_s29 = int_to_ptr.vmem [resolvable:$true] %s345_s29 }
  0x57   : > { %s2858_s26 = scalar_lea.hbm %s3059_s1, %s2247_s25  ;;  %s352_s27 = sand.u32 1, %s2652_s12  }
  0x58   : > { %s335_s5 = scalar_lea.sflag [#allocation3], %s334_s22  ;;  %s2516_s7 = scalar_lea.hbm %s2844_s28, 64 }
  0x59   : > { %p2517_p9 = scmp.ne.s32.totalorder %s2844_s28, %s2516_s7  ;;  %p2518_p10 = pneg %p2851_p7 }
  0x5a   : > { %s2521_s14 = scalar_lea.hbm %s3058_s0, 128  ;;  %p2522_p13 = scmp.lt.s32.totalorder %s2844_s28, %s3058_s0 }
  0x5b   : > { %p2519_p11 = pnand %p2518_p10, %p2517_p9  ;;  %p2523_p0 = scmp.lt.s32.totalorder %s2521_s14, %s2516_s7 }
  0x5d   : > { %p2520_p12 = pneg %p2519_p11  ;;  %p2524_p2 = por %p2523_p0, %p2522_p13 }
  0x5f   : > { %p2525_p4 = pnand %p2524_p2, %p2520_p12 }
  0x61   : > { %2528 = shalt.err (!%p2525_p4)
}
  0x62   : > { %s2529_s4 = scalar_lea.vmem %s2847_s29, 64  ;;  %s2664_s22 = smov [#allocation2]  }
  0x63   : > { %p2530_p1 = scmp.ne.s32.totalorder %s2847_s29, %s2529_s4  ;;  %s2534_s25 = sshll.u32 %s2664_s22, 4  ;;  %s2535_s25 = int_to_ptr.vmem [resolvable:$false] %s2534_s25 }
  0x64   : > { %s2536_s17 = scalar_lea.vmem %s2535_s25, 128  ;;  %p2537_p8 = scmp.lt.s32.totalorder %s2847_s29, %s2535_s25 }
  0x65   : > { %p2532_p9 = pnand %p2530_p1, %p2518_p10  ;;  %p2538_p5 = scmp.lt.s32.totalorder %s2536_s17, %s2529_s4 }
  0x67   : > { %p2533_p11 = pneg %p2532_p9  ;;  %p2539_p6 = por %p2538_p5, %p2537_p8 }
  0x69   : > { %p2540_p13 = pnand %p2539_p6, %p2533_p11 }
  0x6b   : > { %2543 = shalt.err (!%p2540_p13)
}
  0x6c   : > { %2334 = dma.hbm_to_vmem [thread:$0]  (!%p2851_p7), %s2844_s28, 64, %s2847_s29, %s335_s5  }
  0x6d   : > { %s356_s7 = scalar_lea.vmem [#allocation5], %s2838_s18  ;;  %s353_s14 = scalar_lea.sflag [#allocation6], %s352_s27 }
  0x6e   : > { %s363_s11 = sshll.u32 %s356_s7, 4  ;;  %s2544_s21 = scalar_lea.hbm %s2858_s26, 64  ;;  %s364_s11 = int_to_ptr.vmem [resolvable:$true] %s363_s11 }
  0x6f   : > { %p2545_p1 = scmp.ne.s32.totalorder %s2858_s26, %s2544_s21  ;;  %s2549_s22 = scalar_lea.hbm %s3059_s1, 128 }
  0x70   : > { %p2550_p5 = scmp.lt.s32.totalorder %s2858_s26, %s3059_s1  ;;  %p2551_p8 = scmp.lt.s32.totalorder %s2549_s22, %s2544_s21 }
  0x71   : > { %p2547_p4 = pnand %p2545_p1, %p2518_p10 }
  0x72   : > { %p2552_p12 = por %p2551_p8, %p2550_p5 }
  0x73   : > { %p2548_p6 = pneg %p2547_p4 }
  0x75   : > { %p2553_p0 = pnand %p2552_p12, %p2548_p6 }
  0x77   : > { %2556 = shalt.err (!%p2553_p0)
}
  0x78   : > { %s2557_s5 = scalar_lea.vmem %s364_s11, 64  ;;  %s2665_s18 = smov [#allocation5]  }
  0x79   : > { %p2558_p2 = scmp.ne.s32.totalorder %s364_s11, %s2557_s5  ;;  %s2562_s28 = sshll.u32 %s2665_s18, 4  ;;  %s2563_s28 = int_to_ptr.vmem [resolvable:$false] %s2562_s28 }
  0x7a   : > { %s2564_s29 = scalar_lea.vmem %s2563_s28, 128  ;;  %p2565_p13 = scmp.lt.s32.totalorder %s364_s11, %s2563_s28 }
  0x7b   : > { %p2560_p9 = pnand %p2558_p2, %p2518_p10  ;;  %p2566_p1 = scmp.lt.s32.totalorder %s2564_s29, %s2557_s5 }
  0x7d   : > { %p2561_p11 = pneg %p2560_p9  ;;  %p2567_p4 = por %p2566_p1, %p2565_p13 }
  0x7f   : > { %p2568_p3 = pnand %p2567_p4, %p2561_p11 }
  0x81   : > { %2571 = shalt.err (!%p2568_p3)
}
  0x82   : > { %2337 = dma.hbm_to_vmem [thread:$0]  (!%p2851_p7), %s2858_s26, 64, %s364_s11, %s353_s14  }
  0x83   : > { %p3090_p6 = scmp.ne.s32.totalorder %s3078_s16, 0 }
  0x84   : > { %s2909_s27 = sand.u32 (!%p3090_p6), 1, %s2644_s10   ;;  %p3091_p10 = scmp.ne.s32.totalorder (!%p3090_p6), %s3086_s20, 0 }
  0x85   : > { %372 = sbr.rel (%p3090_p6) target bundleno = 1012 (0x3f4), region = 56  ;;  %s2251_s7 = sshll.u32 (!%p3090_p6), %s2909_s27, 2 }
  0x86   : > { %s375_s21 = scalar_lea.sflag (!%p3090_p6), [#allocation3], %s2909_s27  ;;  %s2913_s2 = scalar_lea.vmem (!%p3090_p6), [#allocation2], %s2251_s7 }
  0x8a   : > { %2615 = dma.done.wait (%p3091_p10), %s375_s21, 64  }
  0x8b   : > { %2617 = vsyncadd (%p3091_p10), %s375_s21, 4294967232  ;;  %s383_s13 = sand.u32 1, %s2740_s15   ;;  %s2920_s26 = scalar_lea.vmem [#allocation5], %s2251_s7 }
  0x8c   : > { %s384_s16 = scalar_lea.sflag [#allocation6], %s383_s13 }
  0x8d   : > { %2619 = dma.done.wait (%p3091_p10), %s384_s16, 64  }
  0x8e   : > { %2621 = vsyncadd (%p3091_p10), %s384_s16, 4294967232  ;;  %p3092_p3 = scmp.eq.s32.totalorder %s2740_s15, 0 }
  0x90   : > { %2623 = dma.done.wait (%p3092_p3), [#allocation6], 24576   ;;  %p3093_p7 = pmov %p3092_p3 }
  0x91   : > { %p3094_p5 = pmov %p3092_p3 }
  0x92   : > { %2625 = vsyncadd (%p3093_p7), [#allocation6], 4294942720 }
  0x93   : > { %2627 = dma.done.wait (%p3094_p5), [#allocation9], 17408   ;;  %p3095_p8 = pmov %p3092_p3 }
  0x94   : > { %p3096_p12 = pmov %p3092_p3 }
  0x95   : > { %2629 = vsyncadd (%p3095_p8), [#allocation9], 4294949888 }
  0x96   : > { %2631 = dma.done.wait (%p3096_p12), [#allocation12], 16384   ;;  %p3097_p0 = pmov %p3092_p3 }
  0x97   : > { %v2666_v0 = vmov 0.0   ;;  %v628_v1 = vld [vmem:[#allocation7 + $0x5a8] sm:$0xff]  ;;  %v627_v2 = vld [vmem:[#allocation7 + $0x5a0] sm:$0xff]  ;;  %v630_v5 = vld [vmem:[#allocation7 + $0x5b8] sm:$0xff]  ;;  %vm2667_vm0 = vmmov 0   ;;  %vm1093_vm1 = vcmask 523264  }
  0x98   : > { %2633 = vsyncadd (%p3097_p0), [#allocation12], 4294950912  ;;  %703 = vmatprep.mubr.f32.mxu0 %v2666_v0  ;;  %774 = vmatprep.mubr.f32.mxu1 %v2666_v0  ;;  %v616_v3 = vld [vmem:[#allocation7 + $0x548] sm:$0xff]  ;;  %v615_v4 = vld [vmem:[#allocation7 + $0x540] sm:$0xff]  ;;  %s2257_s29 = sshll.u32 %s2909_s27, 4  ;;  %s2267_s7 = sshll.u32 %s2740_s15, 8 }
  0x99   : > { %639 = vmatprep.subr.mxu0 %v628_v1  ;;  %v604_v6 = vld [vmem:[#allocation7 + $0x4e8] sm:$0xff]  ;;  %710 = vmatprep.subr.mxu1 %v630_v5  ;;  %v629_v7 = vld [vmem:[#allocation7 + $0x5b0] sm:$0xff]  ;;  %v603_v8 = vld [vmem:[#allocation7 + $0x4e0] sm:$0xff]  ;;  %s442_s21 = scalar_lea.vmem [#allocation13], %s2257_s29  ;;  %s2094_s20 = scalar_lea.sflag [#allocation4], %s2909_s27 }
  0x9a   : > { %640 = vmatpush1.msra.mxu0 %v627_v2  ;;  %711 = vmatpush1.msra.mxu1 %v629_v7  ;;  %v618_v9 = vld [vmem:[#allocation7 + $0x558] sm:$0xff]  ;;  %v617_v10 = vld [vmem:[#allocation7 + $0x550] sm:$0xff]  ;;  %v592_v11 = vld [vmem:[#allocation7 + $0x488] sm:$0xff]  ;;  %p3098_p9 = scmp.ne.s32.totalorder %s3087_s23, 0  ;;  %s2668_s15 = smov [#allocation13]  }
  0x9b   : > { %641 = vmatprep.subr.mxu0 %v616_v3  ;;  %712 = vmatprep.subr.mxu1 %v618_v9  ;;  %v606_v12 = vld [vmem:[#allocation7 + $0x4f8] sm:$0xff]  ;;  %v591_v13 = vld [vmem:[#allocation7 + $0x480] sm:$0xff]  ;;  %v605_v14 = vld [vmem:[#allocation7 + $0x4f0] sm:$0xff]  ;;  %s2576_s14 = sshll.u32 %s2668_s15, 4  ;;  %s2577_s14 = int_to_ptr.vmem [resolvable:$false] %s2576_s14 }
  0x9c   : > { %642 = vmatpush1.msra.mxu0 %v615_v4  ;;  %713 = vmatpush1.msra.mxu1 %v617_v10  ;;  %v594_v15 = vld [vmem:[#allocation7 + $0x498] sm:$0xff]  ;;  %v580_v16 = vld [vmem:[#allocation7 + $0x428] sm:$0xff]  ;;  %v593_v17 = vld [vmem:[#allocation7 + $0x490] sm:$0xff]  ;;  %s2578_s4 = scalar_lea.vmem %s2577_s14, 512 }
  0x9d   : > { %643 = vmatprep.subr.mxu0 %v604_v6  ;;  %714 = vmatprep.subr.mxu1 %v606_v12  ;;  %v579_v18 = vld [vmem:[#allocation7 + $0x420] sm:$0xff]  ;;  %v582_v19 = vld [vmem:[#allocation7 + $0x438] sm:$0xff]  ;;  %v568_v20 = vld [vmem:[#allocation7 + $0x3c8] sm:$0xff] }
  0x9e   : > { %644 = vmatpush1.msra.mxu0 %v603_v8  ;;  %715 = vmatpush1.msra.mxu1 %v605_v14  ;;  %v581_v21 = vld [vmem:[#allocation7 + $0x430] sm:$0xff]  ;;  %v567_v22 = vld [vmem:[#allocation7 + $0x3c0] sm:$0xff]  ;;  %v570_v23 = vld [vmem:[#allocation7 + $0x3d8] sm:$0xff] }
  0x9f   : > { %645 = vmatprep.subr.mxu0 %v592_v11  ;;  %716 = vmatprep.subr.mxu1 %v594_v15  ;;  %v556_v24 = vld [vmem:[#allocation7 + $0x368] sm:$0xff]  ;;  %v569_v25 = vld [vmem:[#allocation7 + $0x3d0] sm:$0xff]  ;;  %v555_v26 = vld [vmem:[#allocation7 + $0x360] sm:$0xff] }
  0xa0   : > { %646 = vmatpush1.msra.mxu0 %v591_v13  ;;  %717 = vmatpush1.msra.mxu1 %v593_v17  ;;  %v558_v27 = vld [vmem:[#allocation7 + $0x378] sm:$0xff]  ;;  %v544_v28 = vld [vmem:[#allocation7 + $0x308] sm:$0xff]  ;;  %v557_v29 = vld [vmem:[#allocation7 + $0x370] sm:$0xff] }
  0xa1   : > { %647 = vmatprep.subr.mxu0 %v580_v16  ;;  %718 = vmatprep.subr.mxu1 %v582_v19  ;;  %v543_v30 = vld [vmem:[#allocation7 + $0x300] sm:$0xff]  ;;  %v546_v31 = vld [vmem:[#allocation7 + $0x318] sm:$0xff]  ;;  %v532_v32 = vld [vmem:[#allocation7 + $0x2a8] sm:$0xff] }
  0xa2   : > { %648 = vmatpush1.msra.mxu0 %v579_v18  ;;  %719 = vmatpush1.msra.mxu1 %v581_v21  ;;  %v545_v33 = vld [vmem:[#allocation7 + $0x310] sm:$0xff]  ;;  %v531_v34 = vld [vmem:[#allocation7 + $0x2a0] sm:$0xff]  ;;  %v534_v35 = vld [vmem:[#allocation7 + $0x2b8] sm:$0xff] }
  0xa3   : > { %649 = vmatprep.subr.mxu0 %v568_v20  ;;  %720 = vmatprep.subr.mxu1 %v570_v23  ;;  %v520_v36 = vld [vmem:[#allocation7 + $0x248] sm:$0xff]  ;;  %v533_v37 = vld [vmem:[#allocation7 + $0x2b0] sm:$0xff]  ;;  %v519_v38 = vld [vmem:[#allocation7 + $0x240] sm:$0xff] }
  0xa4   : > { %650 = vmatpush1.msra.mxu0 %v567_v22  ;;  %721 = vmatpush1.msra.mxu1 %v569_v25  ;;  %v522_v39 = vld [vmem:[#allocation7 + $0x258] sm:$0xff]  ;;  %v508_v40 = vld [vmem:[#allocation7 + $0x1e8] sm:$0xff]  ;;  %v521_v41 = vld [vmem:[#allocation7 + $0x250] sm:$0xff] }
  0xa5   : > { %651 = vmatprep.subr.mxu0 %v556_v24  ;;  %722 = vmatprep.subr.mxu1 %v558_v27  ;;  %v507_v42 = vld [vmem:[#allocation7 + $0x1e0] sm:$0xff]  ;;  %v510_v43 = vld [vmem:[#allocation7 + $0x1f8] sm:$0xff]  ;;  %v496_v44 = vld [vmem:[#allocation7 + $0x188] sm:$0xff] }
  0xa6   : > { %652 = vmatpush1.msra.mxu0 %v555_v26  ;;  %723 = vmatpush1.msra.mxu1 %v557_v29  ;;  %v509_v45 = vld [vmem:[#allocation7 + $0x1f0] sm:$0xff]  ;;  %v495_v46 = vld [vmem:[#allocation7 + $0x180] sm:$0xff]  ;;  %v498_v47 = vld [vmem:[#allocation7 + $0x198] sm:$0xff] }
  0xa7   : > { %653 = vmatprep.subr.mxu0 %v544_v28  ;;  %724 = vmatprep.subr.mxu1 %v546_v31  ;;  %v484_v48 = vld [vmem:[#allocation7 + $0x128] sm:$0xff]  ;;  %v497_v49 = vld [vmem:[#allocation7 + $0x190] sm:$0xff]  ;;  %v483_v50 = vld [vmem:[#allocation7 + $0x120] sm:$0xff] }
  0xa8   : > { %654 = vmatpush1.msra.mxu0 %v543_v30  ;;  %725 = vmatpush1.msra.mxu1 %v545_v33  ;;  %v486_v51 = vld [vmem:[#allocation7 + $0x138] sm:$0xff]  ;;  %v472_v52 = vld [vmem:[#allocation7 + $0xc8] sm:$0xff]  ;;  %v485_v53 = vld [vmem:[#allocation7 + $0x130] sm:$0xff] }
  0xa9   : > { %655 = vmatprep.subr.mxu0 %v532_v32  ;;  %726 = vmatprep.subr.mxu1 %v534_v35  ;;  %v471_v54 = vld [vmem:[#allocation7 + $0xc0] sm:$0xff]  ;;  %v474_v55 = vld [vmem:[#allocation7 + $0xd8] sm:$0xff]  ;;  %v460_v56 = vld [vmem:[#allocation7 + $0x68] sm:$0xff] }
  0xaa   : > { %656 = vmatpush1.msra.mxu0 %v531_v34  ;;  %727 = vmatpush1.msra.mxu1 %v533_v37  ;;  %v473_v57 = vld [vmem:[#allocation7 + $0xd0] sm:$0xff]  ;;  %v459_v59 = vld [vmem:[#allocation7 + $0x60] sm:$0xff]  ;;  %v462_v60 = vld [vmem:[#allocation7 + $0x78] sm:$0xff] }
  0xab   : > { %657 = vmatprep.subr.mxu0 %v520_v36  ;;  %728 = vmatprep.subr.mxu1 %v522_v39  ;;  %v443_v58 = vld [vmem:[%s2913_s2] sm:$0xf]  ;;  %v448_v61 = vld [vmem:[#allocation7 + $0x8] sm:$0xff]  ;;  %v447_v63 = vld [vmem:[#allocation7] sm:$0xff]  ;;  %s2108_s2 = sshll.u32 %s442_s21, 4  ;;  %s2109_s2 = int_to_ptr.vmem [resolvable:$true] %s2108_s2 }
  0xac   : > { %658 = vmatpush1.msra.mxu0 %v519_v38  ;;  %729 = vmatpush1.msra.mxu1 %v521_v41  ;;  %v461_v62 = vld [vmem:[#allocation7 + $0x70] sm:$0xff]  ;;  %v2941_v1 = vunpack.c.l.bf16 %v443_v58  ;;  %v450_v2 = vld [vmem:[#allocation7 + $0x18] sm:$0xff]  ;;  %v632_v3 = vld [vmem:[#allocation7 + $0x5c8] sm:$0xff]  ;;  %s2572_s11 = scalar_lea.vmem %s2109_s2, 256  ;;  %p2579_p1 = scmp.lt.s32.totalorder %s2109_s2, %s2577_s14 }
  0xad   : > { %659 = vmatprep.subr.mxu0 %v508_v40  ;;  %730 = vmatprep.subr.mxu1 %v510_v43  ;;  %v631_v4 = vld [vmem:[#allocation7 + $0x5c0] sm:$0xff]  ;;  %v449_v5 = vld [vmem:[#allocation7 + $0x10] sm:$0xff]  ;;  %v620_v6 = vld [vmem:[#allocation7 + $0x568] sm:$0xff]  ;;  %p2573_p2 = scmp.ne.s32.totalorder %s2109_s2, %s2572_s11  ;;  %p2580_p4 = scmp.lt.s32.totalorder %s2578_s4, %s2572_s11 }
  0xae   : > { %660 = vmatpush1.msra.mxu0 %v507_v42  ;;  %731 = vmatpush1.msra.mxu1 %v509_v45  ;;  %v619_v7 = vld [vmem:[#allocation7 + $0x560] sm:$0xff]  ;;  %v634_v8 = vld [vmem:[#allocation7 + $0x5d8] sm:$0xff]  ;;  %v608_v9 = vld [vmem:[#allocation7 + $0x508] sm:$0xff] }
  0xaf   : > { %661 = vmatprep.subr.mxu0 %v496_v44  ;;  %732 = vmatprep.subr.mxu1 %v498_v47  ;;  %v633_v10 = vld [vmem:[#allocation7 + $0x5d0] sm:$0xff]  ;;  %v607_v11 = vld [vmem:[#allocation7 + $0x500] sm:$0xff]  ;;  %v622_v12 = vld [vmem:[#allocation7 + $0x578] sm:$0xff]  ;;  %p2574_p11 = pnand %p2573_p2, %p3098_p9  ;;  %p2581_p6 = por %p2580_p4, %p2579_p1 }
  0xb0   : > { %662 = vmatpush1.msra.mxu0 %v495_v46  ;;  %733 = vmatpush1.msra.mxu1 %v497_v49  ;;  %v596_v13 = vld [vmem:[#allocation7 + $0x4a8] sm:$0xff]  ;;  %v621_v14 = vld [vmem:[#allocation7 + $0x570] sm:$0xff]  ;;  %v595_v15 = vld [vmem:[#allocation7 + $0x4a0] sm:$0xff] }
  0xb1   : > { %663 = vmatprep.subr.mxu0 %v484_v48  ;;  %734 = vmatprep.subr.mxu1 %v486_v51  ;;  %v610_v16 = vld [vmem:[#allocation7 + $0x518] sm:$0xff]  ;;  %v584_v17 = vld [vmem:[#allocation7 + $0x448] sm:$0xff]  ;;  %v609_v18 = vld [vmem:[#allocation7 + $0x510] sm:$0xff]  ;;  %p2575_p13 = pneg %p2574_p11 }
  0xb2   : > { %664 = vmatpush1.msra.mxu0 %v483_v50  ;;  %735 = vmatpush1.msra.mxu1 %v485_v53  ;;  %v583_v19 = vld [vmem:[#allocation7 + $0x440] sm:$0xff]  ;;  %v598_v20 = vld [vmem:[#allocation7 + $0x4b8] sm:$0xff]  ;;  %v572_v21 = vld [vmem:[#allocation7 + $0x3e8] sm:$0xff] }
  0xb3   : > { %665 = vmatprep.subr.mxu0 %v472_v52  ;;  %736 = vmatprep.subr.mxu1 %v474_v55  ;;  %v597_v22 = vld [vmem:[#allocation7 + $0x4b0] sm:$0xff]  ;;  %v571_v23 = vld [vmem:[#allocation7 + $0x3e0] sm:$0xff]  ;;  %v586_v24 = vld [vmem:[#allocation7 + $0x458] sm:$0xff]  ;;  %p2582_p10 = pnand %p2581_p6, %p2575_p13 }
  0xb4   : > { %666 = vmatpush1.msra.mxu0 %v471_v54  ;;  %737 = vmatpush1.msra.mxu1 %v473_v57  ;;  %v560_v25 = vld [vmem:[#allocation7 + $0x388] sm:$0xff]  ;;  %v585_v26 = vld [vmem:[#allocation7 + $0x450] sm:$0xff]  ;;  %v559_v27 = vld [vmem:[#allocation7 + $0x380] sm:$0xff] }
  0xb5   : > { %667 = vmatprep.subr.mxu0 %v460_v56  ;;  %738 = vmatprep.subr.mxu1 %v462_v60  ;;  %v574_v28 = vld [vmem:[#allocation7 + $0x3f8] sm:$0xff]  ;;  %v548_v29 = vld [vmem:[#allocation7 + $0x328] sm:$0xff]  ;;  %v573_v30 = vld [vmem:[#allocation7 + $0x3f0] sm:$0xff] }
  0xb6   : > { %668 = vmatpush1.msra.mxu0 %v459_v59  ;;  %739 = vmatpush1.msra.mxu1 %v461_v62  ;;  %v547_v31 = vld [vmem:[#allocation7 + $0x320] sm:$0xff]  ;;  %v562_v32 = vld [vmem:[#allocation7 + $0x398] sm:$0xff]  ;;  %v536_v33 = vld [vmem:[#allocation7 + $0x2c8] sm:$0xff] }
  0xb7   : > { %669 = vmatprep.subr.mxu0 %v448_v61  ;;  %740 = vmatprep.subr.mxu1 %v450_v2  ;;  %v561_v34 = vld [vmem:[#allocation7 + $0x390] sm:$0xff]  ;;  %v535_v35 = vld [vmem:[#allocation7 + $0x2c0] sm:$0xff]  ;;  %v550_v36 = vld [vmem:[#allocation7 + $0x338] sm:$0xff] }
  0xb8   : > { %670 = vmatpush1.msra.mxu0 %v447_v63  ;;  %741 = vmatpush1.msra.mxu1 %v449_v5  ;;  %v524_v37 = vld [vmem:[#allocation7 + $0x268] sm:$0xff]  ;;  %v549_v38 = vld [vmem:[#allocation7 + $0x330] sm:$0xff]  ;;  %v523_v39 = vld [vmem:[#allocation7 + $0x260] sm:$0xff] }
  0xb9   : > { %704 = vmatmul.mubr.f32.vlgmr.msra.gmra.mxu0 %v2941_v1  ;;  %781 = vmatprep.subr.mxu0 %v632_v3  ;;  %v538_v40 = vld [vmem:[#allocation7 + $0x2d8] sm:$0xff]  ;;  %v512_v41 = vld [vmem:[#allocation7 + $0x208] sm:$0xff]  ;;  %v537_v42 = vld [vmem:[#allocation7 + $0x2d0] sm:$0xff] }
  0xba   : > { %782 = vmatpush1.msra.mxu0 %v631_v4  ;;  %775 = vmatmul.mubr.f32.vlgmr.msra.gmra.mxu1 %v2941_v1  ;;  %v511_v43 = vld [vmem:[#allocation7 + $0x200] sm:$0xff]  ;;  %v526_v44 = vld [vmem:[#allocation7 + $0x278] sm:$0xff]  ;;  %v500_v45 = vld [vmem:[#allocation7 + $0x1a8] sm:$0xff] }
  0xbb   : > { %783 = vmatprep.subr.mxu0 %v620_v6  ;;  %852 = vmatprep.subr.mxu1 %v634_v8  ;;  %v525_v46 = vld [vmem:[#allocation7 + $0x270] sm:$0xff]  ;;  %v499_v47 = vld [vmem:[#allocation7 + $0x1a0] sm:$0xff]  ;;  %v514_v48 = vld [vmem:[#allocation7 + $0x218] sm:$0xff] }
  0xbc   : > { %784 = vmatpush1.msra.mxu0 %v619_v7  ;;  %853 = vmatpush1.msra.mxu1 %v633_v10  ;;  %v488_v49 = vld [vmem:[#allocation7 + $0x148] sm:$0xff]  ;;  %v513_v50 = vld [vmem:[#allocation7 + $0x210] sm:$0xff]  ;;  %v487_v51 = vld [vmem:[#allocation7 + $0x140] sm:$0xff] }
  0xbd   : > { %785 = vmatprep.subr.mxu0 %v608_v9  ;;  %854 = vmatprep.subr.mxu1 %v622_v12  ;;  %v502_v52 = vld [vmem:[#allocation7 + $0x1b8] sm:$0xff]  ;;  %v476_v53 = vld [vmem:[#allocation7 + $0xe8] sm:$0xff]  ;;  %v501_v54 = vld [vmem:[#allocation7 + $0x1b0] sm:$0xff] }
  0xbe   : > { %786 = vmatpush1.msra.mxu0 %v607_v11  ;;  %855 = vmatpush1.msra.mxu1 %v621_v14  ;;  %v475_v55 = vld [vmem:[#allocation7 + $0xe0] sm:$0xff]  ;;  %v490_v56 = vld [vmem:[#allocation7 + $0x158] sm:$0xff]  ;;  %v464_v57 = vld [vmem:[#allocation7 + $0x88] sm:$0xff] }
  0xbf   : > { %787 = vmatprep.subr.mxu0 %v596_v13  ;;  %856 = vmatprep.subr.mxu1 %v610_v16  ;;  %v489_v58 = vld [vmem:[#allocation7 + $0x150] sm:$0xff]  ;;  %v463_v59 = vld [vmem:[#allocation7 + $0x80] sm:$0xff]  ;;  %v478_v60 = vld [vmem:[#allocation7 + $0xf8] sm:$0xff] }
  0xc0   : > { %788 = vmatpush1.msra.mxu0 %v595_v15  ;;  %857 = vmatpush1.msra.mxu1 %v609_v18  ;;  %v452_v61 = vld [vmem:[#allocation7 + $0x28] sm:$0xff]  ;;  %v451_v62 = vld [vmem:[#allocation7 + $0x20] sm:$0xff]  ;;  %v477_v63 = vld [vmem:[#allocation7 + $0xf0] sm:$0xff] }
  0xc1   : > { %789 = vmatprep.subr.mxu0 %v584_v17  ;;  %858 = vmatprep.subr.mxu1 %v598_v20  ;;  %v466_v2 = vld [vmem:[#allocation7 + $0x98] sm:$0xff]  ;;  %v636_v3 = vld [vmem:[#allocation7 + $0x5e8] sm:$0xff]  ;;  %v465_v4 = vld [vmem:[#allocation7 + $0x90] sm:$0xff] }
  0xc2   : > { %790 = vmatpush1.msra.mxu0 %v583_v19  ;;  %859 = vmatpush1.msra.mxu1 %v597_v22  ;;  %v635_v5 = vld [vmem:[#allocation7 + $0x5e0] sm:$0xff]  ;;  %v454_v6 = vld [vmem:[#allocation7 + $0x38] sm:$0xff]  ;;  %v624_v7 = vld [vmem:[#allocation7 + $0x588] sm:$0xff] }
  0xc3   : > { %791 = vmatprep.subr.mxu0 %v572_v21  ;;  %860 = vmatprep.subr.mxu1 %v586_v24  ;;  %v453_v8 = vld [vmem:[#allocation7 + $0x30] sm:$0xff]  ;;  %v623_v9 = vld [vmem:[#allocation7 + $0x580] sm:$0xff]  ;;  %v612_v10 = vld [vmem:[#allocation7 + $0x528] sm:$0xff] }
  0xc4   : > { %792 = vmatpush1.msra.mxu0 %v571_v23  ;;  %861 = vmatpush1.msra.mxu1 %v585_v26  ;;  %v638_v11 = vld [vmem:[#allocation7 + $0x5f8] sm:$0xff]  ;;  %v611_v12 = vld [vmem:[#allocation7 + $0x520] sm:$0xff]  ;;  %v637_v13 = vld [vmem:[#allocation7 + $0x5f0] sm:$0xff] }
  0xc5   : > { %793 = vmatprep.subr.mxu0 %v560_v25  ;;  %862 = vmatprep.subr.mxu1 %v574_v28  ;;  %v600_v14 = vld [vmem:[#allocation7 + $0x4c8] sm:$0xff]  ;;  %v626_v15 = vld [vmem:[#allocation7 + $0x598] sm:$0xff]  ;;  %v599_v16 = vld [vmem:[#allocation7 + $0x4c0] sm:$0xff] }
  0xc6   : > { %794 = vmatpush1.msra.mxu0 %v559_v27  ;;  %863 = vmatpush1.msra.mxu1 %v573_v30  ;;  %v625_v17 = vld [vmem:[#allocation7 + $0x590] sm:$0xff]  ;;  %v588_v18 = vld [vmem:[#allocation7 + $0x468] sm:$0xff]  ;;  %v614_v19 = vld [vmem:[#allocation7 + $0x538] sm:$0xff] }
  0xc7   : > { %795 = vmatprep.subr.mxu0 %v548_v29  ;;  %864 = vmatprep.subr.mxu1 %v562_v32  ;;  %v587_v20 = vld [vmem:[#allocation7 + $0x460] sm:$0xff]  ;;  %v613_v21 = vld [vmem:[#allocation7 + $0x530] sm:$0xff]  ;;  %v576_v22 = vld [vmem:[#allocation7 + $0x408] sm:$0xff] }
  0xc8   : > { %796 = vmatpush1.msra.mxu0 %v547_v31  ;;  %865 = vmatpush1.msra.mxu1 %v561_v34  ;;  %v602_v23 = vld [vmem:[#allocation7 + $0x4d8] sm:$0xff]  ;;  %v575_v24 = vld [vmem:[#allocation7 + $0x400] sm:$0xff]  ;;  %v601_v25 = vld [vmem:[#allocation7 + $0x4d0] sm:$0xff] }
  0xc9   : > { %797 = vmatprep.subr.mxu0 %v536_v33  ;;  %866 = vmatprep.subr.mxu1 %v550_v36  ;;  %v564_v26 = vld [vmem:[#allocation7 + $0x3a8] sm:$0xff]  ;;  %v590_v27 = vld [vmem:[#allocation7 + $0x478] sm:$0xff]  ;;  %v563_v28 = vld [vmem:[#allocation7 + $0x3a0] sm:$0xff] }
  0xca   : > { %798 = vmatpush1.msra.mxu0 %v535_v35  ;;  %867 = vmatpush1.msra.mxu1 %v549_v38  ;;  %v589_v29 = vld [vmem:[#allocation7 + $0x470] sm:$0xff]  ;;  %v552_v30 = vld [vmem:[#allocation7 + $0x348] sm:$0xff]  ;;  %v578_v31 = vld [vmem:[#allocation7 + $0x418] sm:$0xff] }
  0xcb   : > { %799 = vmatprep.subr.mxu0 %v524_v37  ;;  %868 = vmatprep.subr.mxu1 %v538_v40  ;;  %v551_v32 = vld [vmem:[#allocation7 + $0x340] sm:$0xff]  ;;  %v577_v33 = vld [vmem:[#allocation7 + $0x410] sm:$0xff]  ;;  %v540_v34 = vld [vmem:[#allocation7 + $0x2e8] sm:$0xff] }
  0xcc   : > { %800 = vmatpush1.msra.mxu0 %v523_v39  ;;  %869 = vmatpush1.msra.mxu1 %v537_v42  ;;  %v566_v35 = vld [vmem:[#allocation7 + $0x3b8] sm:$0xff]  ;;  %v539_v36 = vld [vmem:[#allocation7 + $0x2e0] sm:$0xff]  ;;  %v565_v37 = vld [vmem:[#allocation7 + $0x3b0] sm:$0xff] }
  0xcd   : > { %801 = vmatprep.subr.mxu0 %v512_v41  ;;  %870 = vmatprep.subr.mxu1 %v526_v44  ;;  %v528_v38 = vld [vmem:[#allocation7 + $0x288] sm:$0xff]  ;;  %v554_v39 = vld [vmem:[#allocation7 + $0x358] sm:$0xff]  ;;  %v527_v40 = vld [vmem:[#allocation7 + $0x280] sm:$0xff] }
  0xce   : > { %802 = vmatpush1.msra.mxu0 %v511_v43  ;;  %871 = vmatpush1.msra.mxu1 %v525_v46  ;;  %v553_v41 = vld [vmem:[#allocation7 + $0x350] sm:$0xff]  ;;  %v516_v42 = vld [vmem:[#allocation7 + $0x228] sm:$0xff]  ;;  %v542_v43 = vld [vmem:[#allocation7 + $0x2f8] sm:$0xff] }
  0xcf   : > { %803 = vmatprep.subr.mxu0 %v500_v45  ;;  %872 = vmatprep.subr.mxu1 %v514_v48  ;;  %v515_v44 = vld [vmem:[#allocation7 + $0x220] sm:$0xff]  ;;  %v541_v45 = vld [vmem:[#allocation7 + $0x2f0] sm:$0xff]  ;;  %v504_v46 = vld [vmem:[#allocation7 + $0x1c8] sm:$0xff] }
  0xd0   : > { %804 = vmatpush1.msra.mxu0 %v499_v47  ;;  %873 = vmatpush1.msra.mxu1 %v513_v50  ;;  %v530_v47 = vld [vmem:[#allocation7 + $0x298] sm:$0xff]  ;;  %v503_v48 = vld [vmem:[#allocation7 + $0x1c0] sm:$0xff]  ;;  %v492_v50 = vld [vmem:[#allocation7 + $0x168] sm:$0xff] }
  0xd1   : > { %805 = vmatprep.subr.mxu0 %v488_v49  ;;  %874 = vmatprep.subr.mxu1 %v502_v52  ;;  %v529_v49 = vld [vmem:[#allocation7 + $0x290] sm:$0xff]  ;;  %v491_v52 = vld [vmem:[#allocation7 + $0x160] sm:$0xff] }
  0xd2   : > { %806 = vmatpush1.msra.mxu0 %v487_v51  ;;  %875 = vmatpush1.msra.mxu1 %v501_v54  ;;  %v518_v51 = vld [vmem:[#allocation7 + $0x238] sm:$0xff]  ;;  %v480_v54 = vld [vmem:[#allocation7 + $0x108] sm:$0xff] }
  0xd3   : > { %807 = vmatprep.subr.mxu0 %v476_v53  ;;  %876 = vmatprep.subr.mxu1 %v490_v56  ;;  %v517_v53 = vld [vmem:[#allocation7 + $0x230] sm:$0xff]  ;;  %v479_v56 = vld [vmem:[#allocation7 + $0x100] sm:$0xff] }
  0xd4   : > { %808 = vmatpush1.msra.mxu0 %v475_v55  ;;  %877 = vmatpush1.msra.mxu1 %v489_v58  ;;  %v506_v55 = vld [vmem:[#allocation7 + $0x1d8] sm:$0xff]  ;;  %v468_v58 = vld [vmem:[#allocation7 + $0xa8] sm:$0xff] }
  0xd5   : > { %809 = vmatprep.subr.mxu0 %v464_v57  ;;  %878 = vmatprep.subr.mxu1 %v478_v60  ;;  %v505_v57 = vld [vmem:[#allocation7 + $0x1d0] sm:$0xff]  ;;  %v467_v60 = vld [vmem:[#allocation7 + $0xa0] sm:$0xff] }
  0xd6   : > { %810 = vmatpush1.msra.mxu0 %v463_v59  ;;  %845 = vmatprep.mubr.f32.mxu0 %v2666_v0  ;;  %v494_v59 = vld [vmem:[#allocation7 + $0x178] sm:$0xff] }
  0xd7   : > { %811 = vmatprep.subr.mxu0 %v452_v61  ;;  %879 = vmatpush1.msra.mxu1 %v477_v63  ;;  %v493_v61 = vld [vmem:[#allocation7 + $0x170] sm:$0xff]  ;;  %v482_v63 = vld [vmem:[#allocation7 + $0x118] sm:$0xff] }
  0xd8   : > { %812 = vmatpush1.msra.mxu0 %v451_v62  ;;  %880 = vmatprep.subr.mxu1 %v466_v2  ;;  %v456_v62 = vld [vmem:[#allocation7 + $0x48] sm:$0xff]  ;;  %v455_v2 = vld [vmem:[#allocation7 + $0x40] sm:$0xff] }
  0xd9   : > { %846 = vmatmul.mubr.f32.vlgmr.msra.gmra.mxu0 %v2941_v1  ;;  %923 = vmatprep.subr.mxu0 %v636_v3  ;;  %v481_v3 = vld [vmem:[#allocation7 + $0x110] sm:$0xff] }
  0xda   : > { %881 = vmatpush1.msra.mxu1 %v465_v4  ;;  %924 = vmatpush1.msra.mxu0 %v635_v5  ;;  %v470_v4 = vld [vmem:[#allocation7 + $0xb8] sm:$0xff]  ;;  %v469_v5 = vld [vmem:[#allocation7 + $0xb0] sm:$0xff] }
  0xdb   : > { %882 = vmatprep.subr.mxu1 %v454_v6  ;;  %925 = vmatprep.subr.mxu0 %v624_v7  ;;  %v1092_v6 = vld [vmem:[#allocation8 + $0x38] sm:$0xff] }
  0xdc   : > { %883 = vmatpush1.msra.mxu1 %v453_v8  ;;  %916 = vmatprep.mubr.f32.mxu1 %v2666_v0  ;;  %v458_v7 = vld [vmem:[#allocation7 + $0x58] sm:$0xff]  ;;  %v457_v8 = vld [vmem:[#allocation7 + $0x50] sm:$0xff] }
  0xdd   : > { %926 = vmatpush1.msra.mxu0 %v623_v9  ;;  %917 = vmatmul.mubr.f32.vlgmr.msra.gmra.mxu1 %v2941_v1  ;;  %v1091_v9 = vld [vmem:[#allocation8 + $0x30] sm:$0xff] }
  0xde   : > { %927 = vmatprep.subr.mxu0 %v612_v10  ;;  %994 = vmatprep.subr.mxu1 %v638_v11  ;;  %v1090_v10 = vld [vmem:[#allocation8 + $0x28] sm:$0xff]  ;;  %v1089_v11 = vld [vmem:[#allocation8 + $0x20] sm:$0xff] }
  0xdf   : > { %928 = vmatpush1.msra.mxu0 %v611_v12  ;;  %995 = vmatpush1.msra.mxu1 %v637_v13  ;;  %v1088_v12 = vld [vmem:[#allocation8 + $0x18] sm:$0xff]  ;;  %v1087_v13 = vld [vmem:[#allocation8 + $0x10] sm:$0xff] }
  0xe0   : > { %929 = vmatprep.subr.mxu0 %v600_v14  ;;  %996 = vmatprep.subr.mxu1 %v626_v15  ;;  %v445_v14 = vld [vmem:[%s2920_s26] sm:$0xf]  ;;  %v1085_v15 = vld [vmem:[#allocation8] sm:$0xff]  ;;  %s2106_s26 = scalar_lea.hbm %s3067_s9, %s2267_s7 }
  0xe1   : > { %930 = vmatpush1.msra.mxu0 %v599_v16  ;;  %997 = vmatpush1.msra.mxu1 %v625_v17  ;;  %v446_v16 = vunpack.c.l.bf16 %v445_v14  ;;  %v1198_v17 = vld [vmem:[#allocation10 + $0xf8] sm:$0xff]  ;;  %v1167_v14 = vld [vmem:[#allocation10] sm:$0xff] }
  0xe2   : > { %931 = vmatprep.subr.mxu0 %v588_v18  ;;  %998 = vmatprep.subr.mxu1 %v614_v19  ;;  %v1197_v18 = vld [vmem:[#allocation10 + $0xf0] sm:$0xff]  ;;  %v1196_v19 = vld [vmem:[#allocation10 + $0xe8] sm:$0xff] }
  0xe3   : > { %932 = vmatpush1.msra.mxu0 %v587_v20  ;;  %999 = vmatpush1.msra.mxu1 %v613_v21  ;;  %v1195_v20 = vld [vmem:[#allocation10 + $0xe0] sm:$0xff]  ;;  %v1231_v21 = vld [vmem:[#allocation10 + $0x1f8] sm:$0xff] }
  0xe4   : > { %933 = vmatprep.subr.mxu0 %v576_v22  ;;  %1000 = vmatprep.subr.mxu1 %v602_v23  ;;  %v1194_v22 = vld [vmem:[#allocation10 + $0xd8] sm:$0xff]  ;;  %v1230_v23 = vld [vmem:[#allocation10 + $0x1f0] sm:$0xff] }
  0xe5   : > { %934 = vmatpush1.msra.mxu0 %v575_v24  ;;  %1001 = vmatpush1.msra.mxu1 %v601_v25  ;;  %v1229_v24 = vld [vmem:[#allocation10 + $0x1e8] sm:$0xff]  ;;  %v1193_v25 = vld [vmem:[#allocation10 + $0xd0] sm:$0xff] }
  0xe6   : > { %935 = vmatprep.subr.mxu0 %v564_v26  ;;  %1002 = vmatprep.subr.mxu1 %v590_v27  ;;  %v1228_v26 = vld [vmem:[#allocation10 + $0x1e0] sm:$0xff]  ;;  %v1192_v27 = vld [vmem:[#allocation10 + $0xc8] sm:$0xff] }
  0xe7   : > { %936 = vmatpush1.msra.mxu0 %v563_v28  ;;  %1003 = vmatpush1.msra.mxu1 %v589_v29  ;;  %v1227_v28 = vld [vmem:[#allocation10 + $0x1d8] sm:$0xff]  ;;  %v1226_v29 = vld [vmem:[#allocation10 + $0x1d0] sm:$0xff] }
  0xe8   : > { %937 = vmatprep.subr.mxu0 %v552_v30  ;;  %1004 = vmatprep.subr.mxu1 %v578_v31  ;;  %v1191_v30 = vld [vmem:[#allocation10 + $0xc0] sm:$0xff]  ;;  %v1225_v31 = vld [vmem:[#allocation10 + $0x1c8] sm:$0xff] }
  0xe9   : > { %938 = vmatpush1.msra.mxu0 %v551_v32  ;;  %1005 = vmatpush1.msra.mxu1 %v577_v33  ;;  %v1190_v32 = vld [vmem:[#allocation10 + $0xb8] sm:$0xff]  ;;  %v1224_v33 = vld [vmem:[#allocation10 + $0x1c0] sm:$0xff] }
  0xea   : > { %939 = vmatprep.subr.mxu0 %v540_v34  ;;  %1006 = vmatprep.subr.mxu1 %v566_v35  ;;  %v1189_v34 = vld [vmem:[#allocation10 + $0xb0] sm:$0xff]  ;;  %v1223_v35 = vld [vmem:[#allocation10 + $0x1b8] sm:$0xff] }
  0xeb   : > { %940 = vmatpush1.msra.mxu0 %v539_v36  ;;  %1007 = vmatpush1.msra.mxu1 %v565_v37  ;;  %v1188_v36 = vld [vmem:[#allocation10 + $0xa8] sm:$0xff]  ;;  %v1222_v37 = vld [vmem:[#allocation10 + $0x1b0] sm:$0xff] }
  0xec   : > { %941 = vmatprep.subr.mxu0 %v528_v38  ;;  %1008 = vmatprep.subr.mxu1 %v554_v39  ;;  %v1187_v38 = vld [vmem:[#allocation10 + $0xa0] sm:$0xff]  ;;  %v1221_v39 = vld [vmem:[#allocation10 + $0x1a8] sm:$0xff] }
  0xed   : > { %942 = vmatpush1.msra.mxu0 %v527_v40  ;;  %1009 = vmatpush1.msra.mxu1 %v553_v41  ;;  %v1186_v40 = vld [vmem:[#allocation10 + $0x98] sm:$0xff]  ;;  %v1220_v41 = vld [vmem:[#allocation10 + $0x1a0] sm:$0xff] }
  0xee   : > { %943 = vmatprep.subr.mxu0 %v516_v42  ;;  %1010 = vmatprep.subr.mxu1 %v542_v43  ;;  %v1185_v42 = vld [vmem:[#allocation10 + $0x90] sm:$0xff]  ;;  %v1219_v43 = vld [vmem:[#allocation10 + $0x198] sm:$0xff] }
  0xef   : > { %944 = vmatpush1.msra.mxu0 %v515_v44  ;;  %1011 = vmatpush1.msra.mxu1 %v541_v45  ;;  %v1184_v44 = vld [vmem:[#allocation10 + $0x88] sm:$0xff]  ;;  %v1218_v45 = vld [vmem:[#allocation10 + $0x190] sm:$0xff] }
  0xf0   : > { %945 = vmatprep.subr.mxu0 %v504_v46  ;;  %1012 = vmatprep.subr.mxu1 %v530_v47  ;;  %v1183_v46 = vld [vmem:[#allocation10 + $0x80] sm:$0xff]  ;;  %v1217_v47 = vld [vmem:[#allocation10 + $0x188] sm:$0xff] }
  0xf1   : > { %946 = vmatpush1.msra.mxu0 %v503_v48  ;;  %1013 = vmatpush1.msra.mxu1 %v529_v49  ;;  %v1182_v48 = vld [vmem:[#allocation10 + $0x78] sm:$0xff]  ;;  %v1216_v49 = vld [vmem:[#allocation10 + $0x180] sm:$0xff] }
  0xf2   : > { %947 = vmatprep.subr.mxu0 %v492_v50  ;;  %1014 = vmatprep.subr.mxu1 %v518_v51  ;;  %v1181_v50 = vld [vmem:[#allocation10 + $0x70] sm:$0xff]  ;;  %v1180_v51 = vld [vmem:[#allocation10 + $0x68] sm:$0xff] }
  0xf3   : > { %948 = vmatpush1.msra.mxu0 %v491_v52  ;;  %1015 = vmatpush1.msra.mxu1 %v517_v53  ;;  %v1179_v52 = vld [vmem:[#allocation10 + $0x60] sm:$0xff]  ;;  %v1215_v53 = vld [vmem:[#allocation10 + $0x178] sm:$0xff] }
  0xf4   : > { %949 = vmatprep.subr.mxu0 %v480_v54  ;;  %1016 = vmatprep.subr.mxu1 %v506_v55  ;;  %v1178_v54 = vld [vmem:[#allocation10 + $0x58] sm:$0xff]  ;;  %v1214_v55 = vld [vmem:[#allocation10 + $0x170] sm:$0xff] }
  0xf5   : > { %950 = vmatpush1.msra.mxu0 %v479_v56  ;;  %1017 = vmatpush1.msra.mxu1 %v505_v57  ;;  %v1177_v56 = vld [vmem:[#allocation10 + $0x50] sm:$0xff]  ;;  %v1213_v57 = vld [vmem:[#allocation10 + $0x168] sm:$0xff] }
  0xf6   : > { %951 = vmatprep.subr.mxu0 %v468_v58  ;;  %1018 = vmatprep.subr.mxu1 %v494_v59  ;;  %v1176_v58 = vld [vmem:[#allocation10 + $0x48] sm:$0xff]  ;;  %v1212_v59 = vld [vmem:[#allocation10 + $0x160] sm:$0xff] }
  0xf7   : > { %952 = vmatpush1.msra.mxu0 %v467_v60  ;;  %1019 = vmatpush1.msra.mxu1 %v493_v61  ;;  %v1175_v60 = vld [vmem:[#allocation10 + $0x40] sm:$0xff]  ;;  %v1211_v61 = vld [vmem:[#allocation10 + $0x158] sm:$0xff] }
  0xf8   : > { %953 = vmatprep.subr.mxu0 %v456_v62  ;;  %1020 = vmatprep.subr.mxu1 %v482_v63  ;;  %v1174_v62 = vld [vmem:[#allocation10 + $0x38] sm:$0xff]  ;;  %v1210_v63 = vld [vmem:[#allocation10 + $0x150] sm:$0xff] }
  0xf9   : > { %954 = vmatpush1.msra.mxu0 %v455_v2  ;;  %987 = vmatprep.mubr.f32.mxu0 %v2666_v0  ;;  %v1173_v2 = vld [vmem:[#allocation10 + $0x30] sm:$0xff] }
  0xfa   : > { %1021 = vmatpush1.msra.mxu1 %v481_v3  ;;  %988 = vmatmul.mubr.f32.vlgmr.msra.gmra.mxu0 %v2941_v1  ;;  %v1209_v3 = vld [vmem:[#allocation10 + $0x148] sm:$0xff] }
  0xfb   : > { %1022 = vmatprep.subr.mxu1 %v470_v4  ;;  %2277 = vmatprep.subr.mxu0 %v2666_v0  ;;  %v1172_v4 = vld [vmem:[#allocation10 + $0x28] sm:$0xff] }
  0xfc   : > { %1023 = vmatpush1.msra.mxu1 %v469_v5  ;;  %2278 = vmatpush3.msra.mxu0 %v1092_v6  ;;  %v1208_v5 = vld [vmem:[#allocation10 + $0x140] sm:$0xff] }
  0xfd   : > { %1024 = vmatprep.subr.mxu1 %v458_v7  ;;  %2279 = vmatprep.subr.mxu0 %v2666_v0  ;;  %v1171_v6 = vld [vmem:[#allocation10 + $0x20] sm:$0xff]  ;;  %v1207_v7 = vld [vmem:[#allocation10 + $0x138] sm:$0xff] }
  0xfe   : > { %1025 = vmatpush1.msra.mxu1 %v457_v8  ;;  %1058 = vmatprep.mubr.f32.mxu1 %v2666_v0  ;;  %v1170_v8 = vld [vmem:[#allocation10 + $0x18] sm:$0xff] }
  0xff   : > { %2280 = vmatpush3.msra.mxu0 %v1091_v9  ;;  %1059 = vmatmul.mubr.f32.vlgmr.msra.gmra.mxu1 %v2941_v1  ;;  %v1086_v1 = vld [vmem:[#allocation8 + $0x8] sm:$0xff]  ;;  %v1206_v9 = vld [vmem:[#allocation10 + $0x130] sm:$0xff] }
 0x100   : > { %2281 = vmatprep.subr.mxu0 %v2666_v0  ;;  %2293 = vmatprep.mubr.msk.f32.mxu0 %vm2667_vm0, %v2666_v0 }
 0x101   : > { %2282 = vmatpush3.msra.mxu0 %v1090_v10  ;;  %1296 = vmatprep.mubr.f32.mxu1 %v2666_v0  ;;  %v1169_v10 = vld [vmem:[#allocation10 + $0x10] sm:$0xff] }
 0x102   : > { %2283 = vmatprep.subr.mxu0 %v2666_v0  ;;  %1232 = vmatprep.subr.mxu1 %v1231_v21 }
 0x103   : > { %2284 = vmatpush3.msra.mxu0 %v1089_v11  ;;  %1233 = vmatpush1.msra.mxu1 %v1230_v23  ;;  %v1205_v11 = vld [vmem:[#allocation10 + $0x128] sm:$0xff] }
 0x104   : > { %2285 = vmatprep.subr.mxu0 %v2666_v0  ;;  %1234 = vmatprep.subr.mxu1 %v1229_v24 }
 0x105   : > { %2286 = vmatpush3.msra.mxu0 %v1088_v12  ;;  %1235 = vmatpush1.msra.mxu1 %v1228_v26  ;;  %v1168_v12 = vld [vmem:[#allocation10 + $0x8] sm:$0xff] }
 0x106   : > { %2287 = vmatprep.subr.mxu0 %v2666_v0  ;;  %1236 = vmatprep.subr.mxu1 %v1227_v28 }
 0x107   : > { %2288 = vmatpush3.msra.mxu0 %v1087_v13  ;;  %1237 = vmatpush1.msra.mxu1 %v1226_v29  ;;  %v1204_v13 = vld [vmem:[#allocation10 + $0x120] sm:$0xff] }
 0x108   : > { %2289 = vmatprep.subr.mxu0 %v2666_v0  ;;  %1238 = vmatprep.subr.mxu1 %v1225_v31 }
 0x109   : > { %2290 = vmatpush3.msra.mxu0 %v1086_v1  ;;  %1239 = vmatpush1.msra.mxu1 %v1224_v33  ;;  %v1203_v1 = vld [vmem:[#allocation10 + $0x118] sm:$0xff] }
 0x10a   : > { %2291 = vmatprep.subr.mxu0 %v2666_v0  ;;  %1240 = vmatprep.subr.mxu1 %v1223_v35 }
 0x10b   : > { %2292 = vmatpush3.msra.mxu0 %v1085_v15  ;;  %1241 = vmatpush1.msra.mxu1 %v1222_v37  ;;  %v1419_v15 = vld [vmem:[#allocation11 + $0xf8] sm:$0xff] }
 0x10c   : > { %2294 = vmatmul.mubr.msk.f32.vlgmr.msra.gmra.mxu0 %vm1093_vm1, %v446_v16  ;;  %1303 = vmatprep.subr.mxu0 %v1198_v17  ;;  %v1202_v16 = vld [vmem:[#allocation10 + $0x110] sm:$0xff]  ;;  %v1201_v17 = vld [vmem:[#allocation10 + $0x108] sm:$0xff] }
 0x10d   : > { %1367 = vmatprep.mubr.f32.mxu0 %v2666_v0  ;;  %1304 = vmatpush1.msra.mxu0 %v1197_v18  ;;  %v1200_v18 = vld [vmem:[#allocation10 + $0x100] sm:$0xff] }
 0x10e   : > { %1305 = vmatprep.subr.mxu0 %v1196_v19  ;;  %1242 = vmatprep.subr.mxu1 %v1221_v39  ;;  %v1452_v19 = vld [vmem:[#allocation11 + $0x1f8] sm:$0xff] }
 0x10f   : > { %1306 = vmatpush1.msra.mxu0 %v1195_v20  ;;  %1243 = vmatpush1.msra.mxu1 %v1220_v41 }
 0x110   : > { %1307 = vmatprep.subr.mxu0 %v1194_v22  ;;  %1244 = vmatprep.subr.mxu1 %v1219_v43 }
 0x111   : > { %1308 = vmatpush1.msra.mxu0 %v1193_v25  ;;  %1245 = vmatpush1.msra.mxu1 %v1218_v45 }
 0x112   : > { %1309 = vmatprep.subr.mxu0 %v1192_v27  ;;  %1246 = vmatprep.subr.mxu1 %v1217_v47  ;;  %v1417_v47 = vld [vmem:[#allocation11 + $0xe8] sm:$0xff] }
 0x113   : > { %1310 = vmatpush1.msra.mxu0 %v1191_v30  ;;  %1247 = vmatpush1.msra.mxu1 %v1216_v49  ;;  %v1415_v49 = vld [vmem:[#allocation11 + $0xd8] sm:$0xff] }
 0x114   : > { %1311 = vmatprep.subr.mxu0 %v1190_v32  ;;  %1248 = vmatprep.subr.mxu1 %v1215_v53  ;;  %v1450_v53 = vld [vmem:[#allocation11 + $0x1e8] sm:$0xff] }
 0x115   : > { %1312 = vmatpush1.msra.mxu0 %v1189_v34  ;;  %1249 = vmatpush1.msra.mxu1 %v1214_v55  ;;  %v1449_v55 = vld [vmem:[#allocation11 + $0x1e0] sm:$0xff] }
 0x116   : > { %1313 = vmatprep.subr.mxu0 %v1188_v36  ;;  %1250 = vmatprep.subr.mxu1 %v1213_v57 }
 0x117   : > { %1314 = vmatpush1.msra.mxu0 %v1187_v38  ;;  %1251 = vmatpush1.msra.mxu1 %v1212_v59  ;;  %v1411_v59 = vld [vmem:[#allocation11 + $0xb8] sm:$0xff] }
 0x118   : > { %1315 = vmatprep.subr.mxu0 %v1186_v40  ;;  %1252 = vmatprep.subr.mxu1 %v1211_v61  ;;  %v1410_v61 = vld [vmem:[#allocation11 + $0xb0] sm:$0xff] }
 0x119   : > { %1316 = vmatpush1.msra.mxu0 %v1185_v42  ;;  %1253 = vmatpush1.msra.mxu1 %v1210_v63  ;;  %v2258_v42 = vld [vmem:[%s3061_s3] ss:$0 sm:$0xff]  ;;  %v1409_v63 = vld [vmem:[#allocation11 + $0xa8] sm:$0xff] }
 0x11a   : > { %1317 = vmatprep.subr.mxu0 %v1184_v44  ;;  %1254 = vmatprep.subr.mxu1 %v1209_v3  ;;  %v1408_v3 = vld [vmem:[#allocation11 + $0xa0] sm:$0xff] }
 0x11b   : > { %1318 = vmatpush1.msra.mxu0 %v1183_v46  ;;  %1255 = vmatpush1.msra.mxu1 %v1208_v5  ;;  %v1418_v46 = vld [vmem:[#allocation11 + $0xf0] sm:$0xff]  ;;  %v1407_v5 = vld [vmem:[#allocation11 + $0x98] sm:$0xff] }
 0x11c   : > { %1319 = vmatprep.subr.mxu0 %v1182_v48  ;;  %1256 = vmatprep.subr.mxu1 %v1207_v7  ;;  %v1416_v48 = vld [vmem:[#allocation11 + $0xe0] sm:$0xff]  ;;  %v1406_v7 = vld [vmem:[#allocation11 + $0x90] sm:$0xff] }
 0x11d   : > { %1320 = vmatpush1.msra.mxu0 %v1181_v50  ;;  %1257 = vmatpush1.msra.mxu1 %v1206_v9  ;;  %v1451_v50 = vld [vmem:[#allocation11 + $0x1f0] sm:$0xff]  ;;  %v1405_v9 = vld [vmem:[#allocation11 + $0x88] sm:$0xff] }
 0x11e   : > { %1321 = vmatprep.subr.mxu0 %v1180_v51  ;;  %1258 = vmatprep.subr.mxu1 %v1205_v11  ;;  %v1414_v51 = vld [vmem:[#allocation11 + $0xd0] sm:$0xff]  ;;  %v1404_v11 = vld [vmem:[#allocation11 + $0x80] sm:$0xff] }
 0x11f   : > { %1322 = vmatpush1.msra.mxu0 %v1179_v52  ;;  %1259 = vmatpush1.msra.mxu1 %v1204_v13  ;;  %v1403_v13 = vld [vmem:[#allocation11 + $0x78] sm:$0xff] }
 0x120   : > { %1323 = vmatprep.subr.mxu0 %v1178_v54  ;;  %1260 = vmatprep.subr.mxu1 %v1203_v1  ;;  %v1413_v54 = vld [vmem:[#allocation11 + $0xc8] sm:$0xff]  ;;  %v1402_v1 = vld [vmem:[#allocation11 + $0x70] sm:$0xff] }
 0x121   : > { %1324 = vmatpush1.msra.mxu0 %v1177_v56  ;;  %1261 = vmatpush1.msra.mxu1 %v1202_v16  ;;  %v1412_v56 = vld [vmem:[#allocation11 + $0xc0] sm:$0xff]  ;;  %v1401_v16 = vld [vmem:[#allocation11 + $0x68] sm:$0xff] }
 0x122   : > { %1325 = vmatprep.subr.mxu0 %v1176_v58  ;;  %1262 = vmatprep.subr.mxu1 %v1201_v17  ;;  %v1448_v58 = vld [vmem:[#allocation11 + $0x1d8] sm:$0xff]  ;;  %v1437_v17 = vld [vmem:[#allocation11 + $0x180] sm:$0xff] }
 0x123   : > { %1326 = vmatpush1.msra.mxu0 %v1175_v60  ;;  %1263 = vmatpush1.msra.mxu1 %v1200_v18  ;;  %v1447_v60 = vld [vmem:[#allocation11 + $0x1d0] sm:$0xff]  ;;  %v1400_v18 = vld [vmem:[#allocation11 + $0x60] sm:$0xff] }
 0x124   : > { %1327 = vmatprep.subr.mxu0 %v1174_v62  ;;  %1453 = vmatprep.subr.mxu1 %v1452_v19  ;;  %v1446_v62 = vld [vmem:[#allocation11 + $0x1c8] sm:$0xff]  ;;  %v1436_v19 = vld [vmem:[#allocation11 + $0x178] sm:$0xff] }
 0x125   : > { %1328 = vmatpush1.msra.mxu0 %v1173_v2  ;;  %v1445_v2 = vld [vmem:[#allocation11 + $0x1c0] sm:$0xff] }
 0x126   : > { %1329 = vmatprep.subr.mxu0 %v1172_v4  ;;  %v1444_v4 = vld [vmem:[#allocation11 + $0x1b8] sm:$0xff] }
 0x127   : > { %1330 = vmatpush1.msra.mxu0 %v1171_v6  ;;  %v1443_v6 = vld [vmem:[#allocation11 + $0x1b0] sm:$0xff] }
 0x128   : > { %1331 = vmatprep.subr.mxu0 %v1170_v8  ;;  %v1442_v8 = vld [vmem:[#allocation11 + $0x1a8] sm:$0xff] }
 0x129   : > { %1332 = vmatpush1.msra.mxu0 %v1169_v10  ;;  %v1441_v10 = vld [vmem:[#allocation11 + $0x1a0] sm:$0xff] }
 0x12a   : > { %1333 = vmatprep.subr.mxu0 %v1168_v12  ;;  %v1440_v12 = vld [vmem:[#allocation11 + $0x198] sm:$0xff] }
 0x12b   : > { %1334 = vmatpush1.msra.mxu0 %v1167_v14  ;;  %v1439_v14 = vld [vmem:[#allocation11 + $0x190] sm:$0xff] }
 0x12c   : > { %1524 = vmatprep.subr.mxu0 %v1419_v15  ;;  %v1438_v15 = vld [vmem:[#allocation11 + $0x188] sm:$0xff] }
 0x179   : > { %v705_v20 = vpop.f32.mrf.mxu0 }
 0x17a   : > { %v776_v23 = vpop.f32.mrf.mxu1 }
 0x17b   : > { %v707_v21 = vpop.f32.mrf.mxu0 }
 0x17c   : > { %v1065_v22 = vmax.f32 %v705_v20, %v707_v21  ;;  %v778_v25 = vpop.f32.mrf.mxu1  ;;  %v1399_v20 = vld [vmem:[#allocation11 + $0x58] sm:$0xff]  ;;  %v1435_v21 = vld [vmem:[#allocation11 + $0x170] sm:$0xff] }
 0x17e   : > { %v1066_v24 = vmax.f32 %v1065_v22, %v776_v23  ;;  %v1398_v22 = vld [vmem:[#allocation11 + $0x50] sm:$0xff]  ;;  %v1434_v23 = vld [vmem:[#allocation11 + $0x168] sm:$0xff] }
 0x180   : > { %v1067_v27 = vmax.f32 %v1066_v24, %v778_v25  ;;  %v1397_v24 = vld [vmem:[#allocation11 + $0x48] sm:$0xff]  ;;  %v1433_v25 = vld [vmem:[#allocation11 + $0x160] sm:$0xff] }
 0x199   : > { %v847_v26 = vpop.f32.mrf.mxu0 }
 0x19a   : > { %v1068_v28 = vmax.f32 %v1067_v27, %v847_v26  ;;  %v1396_v26 = vld [vmem:[#allocation11 + $0x40] sm:$0xff]  ;;  %v1432_v27 = vld [vmem:[#allocation11 + $0x158] sm:$0xff] }
 0x19b   : > { %v849_v29 = vpop.f32.mrf.mxu0 }
 0x19c   : > { %v1069_v30 = vmax.f32 %v1068_v28, %v849_v29  ;;  %v1395_v28 = vld [vmem:[#allocation11 + $0x38] sm:$0xff]  ;;  %v1431_v29 = vld [vmem:[#allocation11 + $0x150] sm:$0xff] }
 0x19d   : > { %v918_v31 = vpop.f32.mrf.mxu1 }
 0x19e   : > { %v1070_v32 = vmax.f32 %v1069_v30, %v918_v31  ;;  %v1394_v30 = vld [vmem:[#allocation11 + $0x30] sm:$0xff]  ;;  %v1430_v31 = vld [vmem:[#allocation11 + $0x148] sm:$0xff] }
 0x19f   : > { %v920_v33 = vpop.f32.mrf.mxu1 }
 0x1a0   : > { %v1071_v34 = vmax.f32 %v1070_v32, %v920_v33  ;;  %v1393_v32 = vld [vmem:[#allocation11 + $0x28] sm:$0xff]  ;;  %v1429_v33 = vld [vmem:[#allocation11 + $0x140] sm:$0xff] }
 0x1ba   : > { %v989_v35 = vpop.f32.mrf.mxu0 }
 0x1bb   : > { %v1072_v36 = vmax.f32 %v1071_v34, %v989_v35  ;;  %v1392_v34 = vld [vmem:[#allocation11 + $0x20] sm:$0xff]  ;;  %v1428_v35 = vld [vmem:[#allocation11 + $0x138] sm:$0xff] }
 0x1bc   : > { %v991_v37 = vpop.f32.mrf.mxu0 }
 0x1bd   : > { %v1073_v38 = vmax.f32 %v1072_v36, %v991_v37  ;;  %v1391_v36 = vld [vmem:[#allocation11 + $0x18] sm:$0xff]  ;;  %v1427_v37 = vld [vmem:[#allocation11 + $0x130] sm:$0xff] }
 0x1bf   : > { %v1060_v39 = vpop.f32.mrf.mxu1 }
 0x1c0   : > { %v1074_v40 = vmax.f32 %v1073_v38, %v1060_v39  ;;  %v1390_v38 = vld [vmem:[#allocation11 + $0x10] sm:$0xff]  ;;  %v1426_v39 = vld [vmem:[#allocation11 + $0x128] sm:$0xff] }
 0x1c1   : > { %v1062_v41 = vpop.f32.mrf.mxu1 }
 0x1c2   : > { %v1075_v43 = vmax.f32 %v1074_v40, %v1062_v41  ;;  %v1389_v40 = vld [vmem:[#allocation11 + $0x8] sm:$0xff]  ;;  %v1425_v41 = vld [vmem:[#allocation11 + $0x120] sm:$0xff] }
 0x1c4   : > { %v1083_v44 = vadd.f32 %v2258_v42, %v1075_v43  ;;  %v1388_v42 = vld [vmem:[#allocation11] sm:$0xff]  ;;  %v1424_v43 = vld [vmem:[#allocation11 + $0x118] sm:$0xff] }
 0x1c6   : > { %v2968_v45 = vmax.f32 %v1083_v44, 0.0  ;;  %v1423_v44 = vld [vmem:[#allocation11 + $0x110] sm:$0xff] }
 0x1c8   : > { %1368 = vmatmul.mubr.f32.vlgmr.msra.gmra.mxu0 %v2968_v45 }
 0x1c9   : > { %1525 = vmatpush1.msra.mxu0 %v1418_v46  ;;  %1588 = vmatprep.mubr.f32.mxu0 %v2666_v0  ;;  %v1422_v46 = vld [vmem:[#allocation11 + $0x108] sm:$0xff] }
 0x1ca   : > { %1526 = vmatprep.subr.mxu0 %v1417_v47  ;;  %v1421_v47 = vld [vmem:[#allocation11 + $0x100] sm:$0xff] }
 0x1cb   : > { %1527 = vmatpush1.msra.mxu0 %v1416_v48  ;;  %v1659_v48 = vld [vmem:[#allocation10 + $0x2f8] sm:$0xff] }
 0x1cc   : > { %v2972_v52 = vpop.f32.mrf.mxu0  ;;  %1528 = vmatprep.subr.mxu0 %v1415_v49  ;;  %v1658_v49 = vld [vmem:[#allocation10 + $0x2f0] sm:$0xff] }
 0x1cd   : > { %1297 = vmatmul.mubr.f32.vlgmr.msra.gmra.mxu1 %v2972_v52  ;;  %1529 = vmatpush1.msra.mxu0 %v1414_v51  ;;  %v1657_v51 = vld [vmem:[#allocation10 + $0x2e8] sm:$0xff] }
 0x1ce   : > { %1454 = vmatpush1.msra.mxu1 %v1451_v50  ;;  %v2295_v57 = vpop.f32.mrf.mxu0  ;;  %1530 = vmatprep.subr.mxu0 %v1413_v54  ;;  %v1692_v50 = vld [vmem:[#allocation10 + $0x3f8] sm:$0xff]  ;;  %v1656_v54 = vld [vmem:[#allocation10 + $0x2e0] sm:$0xff] }
 0x1cf   : > { %1455 = vmatprep.subr.mxu1 %v1450_v53  ;;  %1531 = vmatpush1.msra.mxu0 %v1412_v56  ;;  %v1691_v53 = vld [vmem:[#allocation10 + $0x3f0] sm:$0xff]  ;;  %v1655_v56 = vld [vmem:[#allocation10 + $0x2d8] sm:$0xff]  ;;  %v1689_v57 = vld [vmem:[#allocation10 + $0x3e0] sm:$0xff] }
 0x1d0   : > { %1456 = vmatpush1.msra.mxu1 %v1449_v55  ;;  %1532 = vmatprep.subr.mxu0 %v1411_v59  ;;  %v1690_v55 = vld [vmem:[#allocation10 + $0x3e8] sm:$0xff]  ;;  %v1688_v59 = vld [vmem:[#allocation10 + $0x3d8] sm:$0xff] }
 0x1d1   : > { %1457 = vmatprep.subr.mxu1 %v1448_v58  ;;  %1533 = vmatpush1.msra.mxu0 %v1410_v61  ;;  %v1654_v58 = vld [vmem:[#allocation10 + $0x2d0] sm:$0xff] }
 0x1d2   : > { %1458 = vmatpush1.msra.mxu1 %v1447_v60  ;;  %1534 = vmatprep.subr.mxu0 %v1409_v63  ;;  %v1653_v60 = vld [vmem:[#allocation10 + $0x2c8] sm:$0xff]  ;;  %v1687_v61 = vld [vmem:[#allocation10 + $0x3d0] sm:$0xff] }
 0x1d3   : > { %1459 = vmatprep.subr.mxu1 %v1446_v62  ;;  %1535 = vmatpush1.msra.mxu0 %v1408_v3  ;;  %v1652_v62 = vld [vmem:[#allocation10 + $0x2c0] sm:$0xff]  ;;  %v1686_v63 = vld [vmem:[#allocation10 + $0x3c8] sm:$0xff] }
 0x1d4   : > { %1460 = vmatpush1.msra.mxu1 %v1445_v2  ;;  %1536 = vmatprep.subr.mxu0 %v1407_v5  ;;  %v1651_v2 = vld [vmem:[#allocation10 + $0x2b8] sm:$0xff]  ;;  %v1685_v3 = vld [vmem:[#allocation10 + $0x3c0] sm:$0xff] }
 0x1d5   : > { %1461 = vmatprep.subr.mxu1 %v1444_v4  ;;  %1537 = vmatpush1.msra.mxu0 %v1406_v7  ;;  %v1650_v4 = vld [vmem:[#allocation10 + $0x2b0] sm:$0xff]  ;;  %v1684_v5 = vld [vmem:[#allocation10 + $0x3b8] sm:$0xff] }
 0x1d6   : > { %1462 = vmatpush1.msra.mxu1 %v1443_v6  ;;  %1538 = vmatprep.subr.mxu0 %v1405_v9  ;;  %v1649_v6 = vld [vmem:[#allocation10 + $0x2a8] sm:$0xff]  ;;  %v1683_v7 = vld [vmem:[#allocation10 + $0x3b0] sm:$0xff] }
 0x1d7   : > { %1463 = vmatprep.subr.mxu1 %v1442_v8  ;;  %1539 = vmatpush1.msra.mxu0 %v1404_v11  ;;  %v1648_v8 = vld [vmem:[#allocation10 + $0x2a0] sm:$0xff]  ;;  %v1682_v9 = vld [vmem:[#allocation10 + $0x3a8] sm:$0xff] }
 0x1d8   : > { %1464 = vmatpush1.msra.mxu1 %v1441_v10  ;;  %1540 = vmatprep.subr.mxu0 %v1403_v13  ;;  %v1647_v10 = vld [vmem:[#allocation10 + $0x298] sm:$0xff]  ;;  %v1681_v11 = vld [vmem:[#allocation10 + $0x3a0] sm:$0xff] }
 0x1d9   : > { %1465 = vmatprep.subr.mxu1 %v1440_v12  ;;  %1541 = vmatpush1.msra.mxu0 %v1402_v1  ;;  %v1646_v12 = vld [vmem:[#allocation10 + $0x290] sm:$0xff]  ;;  %v1680_v13 = vld [vmem:[#allocation10 + $0x398] sm:$0xff] }
 0x1da   : > { %1466 = vmatpush1.msra.mxu1 %v1439_v14  ;;  %1542 = vmatprep.subr.mxu0 %v1401_v16  ;;  %v1645_v14 = vld [vmem:[#allocation10 + $0x288] sm:$0xff]  ;;  %v1679_v1 = vld [vmem:[#allocation10 + $0x390] sm:$0xff] }
 0x1db   : > { %1467 = vmatprep.subr.mxu1 %v1438_v15  ;;  %1543 = vmatpush1.msra.mxu0 %v1400_v18  ;;  %v1644_v15 = vld [vmem:[#allocation10 + $0x280] sm:$0xff]  ;;  %v1678_v16 = vld [vmem:[#allocation10 + $0x388] sm:$0xff] }
 0x1dc   : > { %1468 = vmatpush1.msra.mxu1 %v1437_v17  ;;  %1544 = vmatprep.subr.mxu0 %v1399_v20  ;;  %v1643_v17 = vld [vmem:[#allocation10 + $0x278] sm:$0xff]  ;;  %v1677_v18 = vld [vmem:[#allocation10 + $0x380] sm:$0xff] }
 0x1dd   : > { %1469 = vmatprep.subr.mxu1 %v1436_v19  ;;  %1545 = vmatpush1.msra.mxu0 %v1398_v22  ;;  %v1642_v19 = vld [vmem:[#allocation10 + $0x270] sm:$0xff]  ;;  %v1676_v20 = vld [vmem:[#allocation10 + $0x378] sm:$0xff] }
 0x1de   : > { %1470 = vmatpush1.msra.mxu1 %v1435_v21  ;;  %1546 = vmatprep.subr.mxu0 %v1397_v24  ;;  %v1641_v21 = vld [vmem:[#allocation10 + $0x268] sm:$0xff]  ;;  %v1675_v22 = vld [vmem:[#allocation10 + $0x370] sm:$0xff] }
 0x1df   : > { %1471 = vmatprep.subr.mxu1 %v1434_v23  ;;  %1547 = vmatpush1.msra.mxu0 %v1396_v26  ;;  %v1640_v23 = vld [vmem:[#allocation10 + $0x260] sm:$0xff]  ;;  %v1674_v24 = vld [vmem:[#allocation10 + $0x368] sm:$0xff] }
 0x1e0   : > { %1472 = vmatpush1.msra.mxu1 %v1433_v25  ;;  %1548 = vmatprep.subr.mxu0 %v1395_v28  ;;  %v1639_v25 = vld [vmem:[#allocation10 + $0x258] sm:$0xff]  ;;  %v1673_v26 = vld [vmem:[#allocation10 + $0x360] sm:$0xff] }
 0x1e1   : > { %1473 = vmatprep.subr.mxu1 %v1432_v27  ;;  %1549 = vmatpush1.msra.mxu0 %v1394_v30  ;;  %v1638_v27 = vld [vmem:[#allocation10 + $0x250] sm:$0xff]  ;;  %v1672_v28 = vld [vmem:[#allocation10 + $0x358] sm:$0xff] }
 0x1e2   : > { %1474 = vmatpush1.msra.mxu1 %v1431_v29  ;;  %1550 = vmatprep.subr.mxu0 %v1393_v32  ;;  %v1637_v29 = vld [vmem:[#allocation10 + $0x248] sm:$0xff]  ;;  %v1671_v30 = vld [vmem:[#allocation10 + $0x350] sm:$0xff] }
 0x1e3   : > { %1475 = vmatprep.subr.mxu1 %v1430_v31  ;;  %1551 = vmatpush1.msra.mxu0 %v1392_v34  ;;  %v1636_v31 = vld [vmem:[#allocation10 + $0x240] sm:$0xff]  ;;  %v1670_v32 = vld [vmem:[#allocation10 + $0x348] sm:$0xff] }
 0x1e4   : > { %1476 = vmatpush1.msra.mxu1 %v1429_v33  ;;  %1552 = vmatprep.subr.mxu0 %v1391_v36  ;;  %v1635_v33 = vld [vmem:[#allocation10 + $0x238] sm:$0xff]  ;;  %v1669_v34 = vld [vmem:[#allocation10 + $0x340] sm:$0xff] }
 0x1e5   : > { %1477 = vmatprep.subr.mxu1 %v1428_v35  ;;  %1553 = vmatpush1.msra.mxu0 %v1390_v38  ;;  %v1634_v35 = vld [vmem:[#allocation10 + $0x230] sm:$0xff]  ;;  %v1668_v36 = vld [vmem:[#allocation10 + $0x338] sm:$0xff] }
 0x1e6   : > { %1478 = vmatpush1.msra.mxu1 %v1427_v37  ;;  %1554 = vmatprep.subr.mxu0 %v1389_v40  ;;  %v1633_v37 = vld [vmem:[#allocation10 + $0x228] sm:$0xff]  ;;  %v1667_v38 = vld [vmem:[#allocation10 + $0x330] sm:$0xff] }
 0x1e7   : > { %1479 = vmatprep.subr.mxu1 %v1426_v39  ;;  %1555 = vmatpush1.msra.mxu0 %v1388_v42  ;;  %v1632_v39 = vld [vmem:[#allocation10 + $0x220] sm:$0xff]  ;;  %v1666_v40 = vld [vmem:[#allocation10 + $0x328] sm:$0xff] }
 0x1e8   : > { %1480 = vmatpush1.msra.mxu1 %v1425_v41  ;;  %1589 = vmatmul.mubr.f32.vlgmr.msra.gmra.mxu0 %v2968_v45  ;;  %v1631_v41 = vld [vmem:[#allocation10 + $0x218] sm:$0xff]  ;;  %v1665_v42 = vld [vmem:[#allocation10 + $0x320] sm:$0xff] }
 0x1e9   : > { %1481 = vmatprep.subr.mxu1 %v1424_v43  ;;  %1517 = vmatprep.mubr.f32.mxu1 %v2666_v0  ;;  %v1630_v43 = vld [vmem:[#allocation10 + $0x210] sm:$0xff] }
 0x1ea   : > { %1482 = vmatpush1.msra.mxu1 %v1423_v44  ;;  %1828 = vmatprep.mubr.f32.mxu0 %v2666_v0  ;;  %v1664_v44 = vld [vmem:[#allocation10 + $0x318] sm:$0xff] }
 0x1eb   : > { %1483 = vmatprep.subr.mxu1 %v1422_v46  ;;  %1764 = vmatprep.subr.mxu0 %v1659_v48  ;;  %v1629_v46 = vld [vmem:[#allocation10 + $0x208] sm:$0xff]  ;;  %v1628_v48 = vld [vmem:[#allocation10 + $0x200] sm:$0xff] }
 0x1ec   : > { %1484 = vmatpush1.msra.mxu1 %v1421_v47  ;;  %1765 = vmatpush1.msra.mxu0 %v1658_v49  ;;  %v1663_v47 = vld [vmem:[#allocation10 + $0x310] sm:$0xff]  ;;  %v1662_v49 = vld [vmem:[#allocation10 + $0x308] sm:$0xff] }
 0x1ed   : > { %1518 = vmatmul.mubr.f32.vlgmr.msra.gmra.mxu1 %v2972_v52  ;;  %1693 = vmatprep.subr.mxu1 %v1692_v50  ;;  %v1882_v50 = vld [vmem:[#allocation11 + $0x2f8] sm:$0xff] }
 0x1ee   : > { %1757 = vmatprep.mubr.f32.mxu1 %v2666_v0  ;;  %1766 = vmatprep.subr.mxu0 %v1657_v51  ;;  %v1661_v51 = vld [vmem:[#allocation10 + $0x300] sm:$0xff] }
 0x1ef   : > { %1694 = vmatpush1.msra.mxu1 %v1691_v53  ;;  %1767 = vmatpush1.msra.mxu0 %v1656_v54  ;;  %v1915_v53 = vld [vmem:[#allocation11 + $0x3f8] sm:$0xff]  ;;  %v1376_v54 = vlaneseq }
 0x1f0   : > { %1695 = vmatprep.subr.mxu1 %v1690_v55  ;;  %1768 = vmatprep.subr.mxu0 %v1655_v56 }
 0x1f1   : > { %1696 = vmatpush1.msra.mxu1 %v1689_v57  ;;  %1769 = vmatpush1.msra.mxu0 %v1654_v58  ;;  %v1377_v56 = vshrl.u32 %v1376_v54, 7  ;;  %v1871_v54 = vld [vmem:[#allocation11 + $0x2a0] sm:$0xff] }
 0x1f2   : > { %1697 = vmatprep.subr.mxu1 %v1688_v59  ;;  %1770 = vmatprep.subr.mxu0 %v1653_v60  ;;  %v1595_v59 = vld [vmem:[%s3066_s8] sm:$0x3] }
 0x1f3   : > { %1698 = vmatpush1.msra.mxu1 %v1687_v61  ;;  %1771 = vmatpush1.msra.mxu0 %v1652_v62  ;;  %v2983_v60 = vsub.s32 0, %v1377_v56 }
 0x1f4   : > { %1699 = vmatprep.subr.mxu1 %v1686_v63  ;;  %1772 = vmatprep.subr.mxu0 %v1651_v2  ;;  %v2985_v63 = vsub.s32 1, %v1377_v56  ;;  %v1870_v56 = vld [vmem:[#allocation11 + $0x298] sm:$0xff] }
 0x1f5   : > { %1700 = vmatpush1.msra.mxu1 %v1685_v3  ;;  %1773 = vmatpush1.msra.mxu0 %v1650_v4  ;;  %v1600_v2 = vrot.slane %v1595_v59, %v2983_v60 }
 0x1f6   : > { %1701 = vmatprep.subr.mxu1 %v1684_v5  ;;  %1774 = vmatprep.subr.mxu0 %v1649_v6  ;;  %v1604_v5 = vrot.slane %v1595_v59, %v2985_v63  ;;  %v1903_v59 = vld [vmem:[#allocation11 + $0x398] sm:$0xff] }
 0x1f7   : > { %1702 = vmatpush1.msra.mxu1 %v1683_v7  ;;  %1775 = vmatpush1.msra.mxu0 %v1648_v8 }
 0x1f8   : > { %1703 = vmatprep.subr.mxu1 %v1682_v9  ;;  %1776 = vmatprep.subr.mxu0 %v1647_v10 }
 0x1f9   : > { %1704 = vmatpush1.msra.mxu1 %v1681_v11  ;;  %1777 = vmatpush1.msra.mxu0 %v1646_v12 }
 0x1fa   : > { %1705 = vmatprep.subr.mxu1 %v1680_v13  ;;  %1778 = vmatprep.subr.mxu0 %v1645_v14 }
 0x1fb   : > { %1706 = vmatpush1.msra.mxu1 %v1679_v1  ;;  %1779 = vmatpush1.msra.mxu0 %v1644_v15  ;;  %v1374_v15 = vld [vmem:[%s3064_s6] sm:$0x3] }
 0x1fc   : > { %1707 = vmatprep.subr.mxu1 %v1678_v16  ;;  %1780 = vmatprep.subr.mxu0 %v1643_v17 }
 0x1fd   : > { %1708 = vmatpush1.msra.mxu1 %v1677_v18  ;;  %1781 = vmatpush1.msra.mxu0 %v1642_v19  ;;  %v1379_v19 = vrot.slane %v1374_v15, %v2983_v60 }
 0x1fe   : > { %1709 = vmatprep.subr.mxu1 %v1676_v20  ;;  %1782 = vmatprep.subr.mxu0 %v1641_v21 }
 0x1ff   : > { %1710 = vmatpush1.msra.mxu1 %v1675_v22  ;;  %1783 = vmatpush1.msra.mxu0 %v1640_v23  ;;  %v1383_v22 = vrot.slane %v1374_v15, %v2985_v63  ;;  %v1860_v15 = vld [vmem:[#allocation11 + $0x248] sm:$0xff] }
 0x200   : > { %1711 = vmatprep.subr.mxu1 %v1674_v24  ;;  %1784 = vmatprep.subr.mxu0 %v1639_v25 }
 0x201   : > { %1712 = vmatpush1.msra.mxu1 %v1673_v26  ;;  %1785 = vmatpush1.msra.mxu0 %v1638_v27 }
 0x202   : > { %1713 = vmatprep.subr.mxu1 %v1672_v28  ;;  %1786 = vmatprep.subr.mxu0 %v1637_v29 }
 0x203   : > { %1714 = vmatpush1.msra.mxu1 %v1671_v30  ;;  %1787 = vmatpush1.msra.mxu0 %v1636_v31 }
 0x204   : > { %1715 = vmatprep.subr.mxu1 %v1670_v32  ;;  %1788 = vmatprep.subr.mxu0 %v1635_v33  ;;  %v1881_v33 = vld [vmem:[#allocation11 + $0x2f0] sm:$0xff] }
 0x205   : > { %1716 = vmatpush1.msra.mxu1 %v1669_v34  ;;  %1789 = vmatpush1.msra.mxu0 %v1634_v35  ;;  %v1880_v35 = vld [vmem:[#allocation11 + $0x2e8] sm:$0xff] }
 0x206   : > { %1717 = vmatprep.subr.mxu1 %v1668_v36  ;;  %1790 = vmatprep.subr.mxu0 %v1633_v37  ;;  %v1914_v37 = vld [vmem:[#allocation11 + $0x3f0] sm:$0xff] }
 0x207   : > { %1718 = vmatpush1.msra.mxu1 %v1667_v38  ;;  %1791 = vmatpush1.msra.mxu0 %v1632_v39  ;;  %v1879_v38 = vld [vmem:[#allocation11 + $0x2e0] sm:$0xff]  ;;  %v1913_v39 = vld [vmem:[#allocation11 + $0x3e8] sm:$0xff] }
 0x208   : > { %1719 = vmatprep.subr.mxu1 %v1666_v40  ;;  %1792 = vmatprep.subr.mxu0 %v1631_v41  ;;  %v1878_v40 = vld [vmem:[#allocation11 + $0x2d8] sm:$0xff]  ;;  %v1877_v41 = vld [vmem:[#allocation11 + $0x2d0] sm:$0xff] }
 0x209   : > { %1720 = vmatpush1.msra.mxu1 %v1665_v42  ;;  %1793 = vmatpush1.msra.mxu0 %v1630_v43  ;;  %v1911_v42 = vld [vmem:[#allocation11 + $0x3d8] sm:$0xff]  ;;  %v1876_v43 = vld [vmem:[#allocation11 + $0x2c8] sm:$0xff] }
 0x20a   : > { %1721 = vmatprep.subr.mxu1 %v1664_v44  ;;  %1794 = vmatprep.subr.mxu0 %v1629_v46  ;;  %v1875_v44 = vld [vmem:[#allocation11 + $0x2c0] sm:$0xff]  ;;  %v1909_v46 = vld [vmem:[#allocation11 + $0x3c8] sm:$0xff] }
 0x20b   : > { %1722 = vmatpush1.msra.mxu1 %v1663_v47  ;;  %1795 = vmatpush1.msra.mxu0 %v1628_v48  ;;  %v1874_v47 = vld [vmem:[#allocation11 + $0x2b8] sm:$0xff]  ;;  %v1908_v48 = vld [vmem:[#allocation11 + $0x3c0] sm:$0xff] }
 0x20c   : > { %1723 = vmatprep.subr.mxu1 %v1662_v49  ;;  %1987 = vmatprep.subr.mxu0 %v1882_v50  ;;  %v1873_v49 = vld [vmem:[#allocation11 + $0x2b0] sm:$0xff]  ;;  %v1907_v50 = vld [vmem:[#allocation11 + $0x3b8] sm:$0xff] }
 0x20d   : > { %1724 = vmatpush1.msra.mxu1 %v1661_v51  ;;  %v1872_v51 = vld [vmem:[#allocation11 + $0x2a8] sm:$0xff] }
 0x20e   : > { %1916 = vmatprep.subr.mxu1 %v1915_v53  ;;  %v1906_v53 = vld [vmem:[#allocation11 + $0x3b0] sm:$0xff] }
 0x288   : > { %v1369_v55 = vpop.f32.mrf.mxu0 }
 0x28a   : > { %v1371_v58 = vpop.f32.mrf.mxu0 }
 0x28d   : > { %v1298_v57 = vpop.f32.mrf.mxu1 }
 0x28e   : > { %v1370_v18 = vadd.f32 %v1369_v55, %v1298_v57  ;;  %v1905_v55 = vld [vmem:[#allocation11 + $0x3a8] sm:$0xff]  ;;  %v1904_v57 = vld [vmem:[#allocation11 + $0x3a0] sm:$0xff] }
 0x28f   : > { %v1300_v61 = vpop.f32.mrf.mxu1 }
 0x290   : > { %v1372_v21 = vadd.f32 %v1371_v58, %v1300_v61  ;;  %v1386_v23 = vadd.f32 %v1379_v19, %v1370_v18  ;;  %v1869_v58 = vld [vmem:[#allocation11 + $0x290] sm:$0xff]  ;;  %v1868_v61 = vld [vmem:[#allocation11 + $0x288] sm:$0xff]  ;;  %v1858_v19 = vld [vmem:[#allocation11 + $0x238] sm:$0xff] }
 0x291   : > { %v1893_v18 = vld [vmem:[#allocation11 + $0x348] sm:$0xff] }
 0x292   : > { %v1387_v24 = vadd.f32 %v1383_v22, %v1372_v21  ;;  %v1609_v25 = vmax.f32 %v1386_v23, 0.0  ;;  %v1857_v21 = vld [vmem:[#allocation11 + $0x230] sm:$0xff]  ;;  %v1891_v22 = vld [vmem:[#allocation11 + $0x338] sm:$0xff]  ;;  %v1856_v23 = vld [vmem:[#allocation11 + $0x228] sm:$0xff] }
 0x294   : > { %v1610_v26 = vmax.f32 %v1387_v24, 0.0  ;;  %v1621_v27 = vsub.f32 %v1609_v25, %v2968_v45  ;;  %v1890_v24 = vld [vmem:[#allocation11 + $0x330] sm:$0xff]  ;;  %v1855_v25 = vld [vmem:[#allocation11 + $0x220] sm:$0xff] }
 0x296   : > { %v1624_v29 = vsub.f32 %v1610_v26, %v2972_v52  ;;  %v1889_v26 = vld [vmem:[#allocation11 + $0x328] sm:$0xff] }
 0x2a8   : > { %v1590_v62 = vpop.f32.mrf.mxu0 }
 0x2aa   : > { %v1592_v6 = vpop.f32.mrf.mxu0 }
 0x2ad   : > { %v1519_v3 = vpop.f32.mrf.mxu1 }
 0x2ae   : > { %v1591_v4 = vadd.f32 %v1590_v62, %v1519_v3  ;;  %v1902_v62 = vld [vmem:[#allocation11 + $0x390] sm:$0xff]  ;;  %v1901_v3 = vld [vmem:[#allocation11 + $0x388] sm:$0xff] }
 0x2af   : > { %v1521_v7 = vpop.f32.mrf.mxu1 }
 0x2b0   : > { %v1607_v8 = vadd.f32 %v1600_v2, %v1591_v4  ;;  %v1593_v9 = vadd.f32 %v1592_v6, %v1521_v7  ;;  %v1867_v2 = vld [vmem:[#allocation11 + $0x280] sm:$0xff]  ;;  %v1866_v4 = vld [vmem:[#allocation11 + $0x278] sm:$0xff]  ;;  %v1865_v6 = vld [vmem:[#allocation11 + $0x270] sm:$0xff] }
 0x2b1   : > { %v1899_v7 = vld [vmem:[#allocation11 + $0x378] sm:$0xff] }
 0x2b2   : > { %v1611_v10 = vsub.f32 0.0, %v1607_v8  ;;  %v1608_v11 = vadd.f32 %v1604_v5, %v1593_v9  ;;  %v1900_v5 = vld [vmem:[#allocation11 + $0x380] sm:$0xff]  ;;  %v1864_v8 = vld [vmem:[#allocation11 + $0x268] sm:$0xff]  ;;  %v1898_v9 = vld [vmem:[#allocation11 + $0x370] sm:$0xff] }
 0x2b4   : > { %v1613_v12 = vmul.f32 1.442695, %v1611_v10  ;;  %v1612_v13 = vsub.f32 0.0, %v1608_v11  ;;  %v1863_v10 = vld [vmem:[#allocation11 + $0x260] sm:$0xff]  ;;  %v1897_v11 = vld [vmem:[#allocation11 + $0x368] sm:$0xff] }
 0x2b6   : > { %2396 = vpow2.f32 %v1613_v12  ;;  %v1615_v14 = vmul.f32 1.442695, %v1612_v13  ;;  %v1862_v12 = vld [vmem:[#allocation11 + $0x258] sm:$0xff]  ;;  %v1896_v13 = vld [vmem:[#allocation11 + $0x360] sm:$0xff] }
 0x2b8   : > { %2398 = vpow2.f32 %v1615_v14  ;;  %v1861_v14 = vld [vmem:[#allocation11 + $0x250] sm:$0xff] }
 0x2c3   : > { %v2397_v1 = vpop.eup %2396 }
 0x2c4   : > { %v1617_v16 = vadd.f32 1.0, %v2397_v1  ;;  %v1895_v1 = vld [vmem:[#allocation11 + $0x358] sm:$0xff] }
 0x2c5   : > { %v2399_v17 = vpop.eup %2398 }
 0x2c6   : > { %2400 = vrcp.f32 %v1617_v16  ;;  %v1618_v20 = vadd.f32 1.0, %v2399_v17  ;;  %v1894_v16 = vld [vmem:[#allocation11 + $0x350] sm:$0xff]  ;;  %v1859_v17 = vld [vmem:[#allocation11 + $0x240] sm:$0xff] }
 0x2c8   : > { %2402 = vrcp.f32 %v1618_v20  ;;  %v1892_v20 = vld [vmem:[#allocation11 + $0x340] sm:$0xff] }
 0x2d3   : > { %v2401_v28 = vpop.eup %2400 }
 0x2d4   : > { %v1622_v30 = vmul.f32 %v2401_v28, %v1621_v27  ;;  %v1854_v27 = vld [vmem:[#allocation11 + $0x218] sm:$0xff]  ;;  %v1888_v28 = vld [vmem:[#allocation11 + $0x320] sm:$0xff] }
 0x2d5   : > { %v2403_v31 = vpop.eup %2402 }
 0x2d6   : > { %v2997_v32 = vadd.f32 %v1622_v30, %v2968_v45  ;;  %v1625_v34 = vmul.f32 %v2403_v31, %v1624_v29  ;;  %v1912_v45 = vld [vmem:[#allocation11 + $0x3e0] sm:$0xff]  ;;  %v1853_v29 = vld [vmem:[#allocation11 + $0x210] sm:$0xff]  ;;  %v1887_v30 = vld [vmem:[#allocation11 + $0x318] sm:$0xff] }
 0x2d7   : > { %v1852_v31 = vld [vmem:[#allocation11 + $0x208] sm:$0xff] }
 0x2d8   : > { %1829 = vmatmul.mubr.f32.vlgmr.msra.gmra.mxu0 %v2997_v32  ;;  %v3001_v36 = vadd.f32 %v1625_v34, %v2972_v52  ;;  %v1910_v52 = vld [vmem:[#allocation11 + $0x3d0] sm:$0xff]  ;;  %v1851_v34 = vld [vmem:[#allocation11 + $0x200] sm:$0xff] }
 0x2d9   : > { %1988 = vmatpush1.msra.mxu0 %v1881_v33  ;;  %2051 = vmatprep.mubr.f32.mxu0 %v2666_v0  ;;  %v1886_v33 = vld [vmem:[#allocation11 + $0x310] sm:$0xff] }
 0x2da   : > { %1989 = vmatprep.subr.mxu0 %v1880_v35  ;;  %1758 = vmatmul.mubr.f32.vlgmr.msra.gmra.mxu1 %v3001_v36  ;;  %v1885_v35 = vld [vmem:[#allocation11 + $0x308] sm:$0xff] }
 0x2db   : > { %1917 = vmatpush1.msra.mxu1 %v1914_v37  ;;  %1990 = vmatpush1.msra.mxu0 %v1879_v38  ;;  %v1884_v37 = vld [vmem:[#allocation11 + $0x300] sm:$0xff] }
 0x2dc   : > { %1918 = vmatprep.subr.mxu1 %v1913_v39  ;;  %1991 = vmatprep.subr.mxu0 %v1878_v40 }
 0x2dd   : > { %1919 = vmatpush1.msra.mxu1 %v1912_v45  ;;  %1992 = vmatpush1.msra.mxu0 %v1877_v41  ;;  %v2261_v45 = vld [vmem:[%s3066_s8 + $0x2] sm:$0x3] }
 0x2de   : > { %1920 = vmatprep.subr.mxu1 %v1911_v42  ;;  %1993 = vmatprep.subr.mxu0 %v1876_v43  ;;  %v2064_v43 = vrot.slane %v2261_v45, %v2983_v60 }
 0x2df   : > { %1921 = vmatpush1.msra.mxu1 %v1910_v52  ;;  %1994 = vmatpush1.msra.mxu0 %v1875_v44 }
 0x2e0   : > { %1922 = vmatprep.subr.mxu1 %v1909_v46  ;;  %1995 = vmatprep.subr.mxu0 %v1874_v47  ;;  %v2068_v46 = vrot.slane %v2261_v45, %v2985_v63 }
 0x2e1   : > { %1923 = vmatpush1.msra.mxu1 %v1908_v48  ;;  %1996 = vmatpush1.msra.mxu0 %v1873_v49 }
 0x2e2   : > { %1924 = vmatprep.subr.mxu1 %v1907_v50  ;;  %1997 = vmatprep.subr.mxu0 %v1872_v51 }
 0x2e3   : > { %1925 = vmatpush1.msra.mxu1 %v1906_v53  ;;  %1998 = vmatpush1.msra.mxu0 %v1871_v54 }
 0x2e4   : > { %1926 = vmatprep.subr.mxu1 %v1905_v55  ;;  %1999 = vmatprep.subr.mxu0 %v1870_v56 }
 0x2e5   : > { %1927 = vmatpush1.msra.mxu1 %v1904_v57  ;;  %2000 = vmatpush1.msra.mxu0 %v1869_v58  ;;  %v2260_v57 = vld [vmem:[%s3064_s6 + $0x2] sm:$0x3] }
 0x2e6   : > { %1928 = vmatprep.subr.mxu1 %v1903_v59  ;;  %2001 = vmatprep.subr.mxu0 %v1868_v61 }
 0x2e7   : > { %1929 = vmatpush1.msra.mxu1 %v1902_v62  ;;  %2002 = vmatpush1.msra.mxu0 %v1867_v2  ;;  %v1841_v62 = vrot.slane %v2260_v57, %v2983_v60 }
 0x2e8   : > { %1930 = vmatprep.subr.mxu1 %v1901_v3  ;;  %2003 = vmatprep.subr.mxu0 %v1866_v4  ;;  %v1845_v4 = vrot.slane %v2260_v57, %v2985_v63 }
 0x2e9   : > { %1931 = vmatpush1.msra.mxu1 %v1900_v5  ;;  %2004 = vmatpush1.msra.mxu0 %v1865_v6 }
 0x2ea   : > { %1932 = vmatprep.subr.mxu1 %v1899_v7  ;;  %2005 = vmatprep.subr.mxu0 %v1864_v8 }
 0x2eb   : > { %1933 = vmatpush1.msra.mxu1 %v1898_v9  ;;  %2006 = vmatpush1.msra.mxu0 %v1863_v10 }
 0x2ec   : > { %1934 = vmatprep.subr.mxu1 %v1897_v11  ;;  %2007 = vmatprep.subr.mxu0 %v1862_v12 }
 0x2ed   : > { %1935 = vmatpush1.msra.mxu1 %v1896_v13  ;;  %2008 = vmatpush1.msra.mxu0 %v1861_v14 }
 0x2ee   : > { %1936 = vmatprep.subr.mxu1 %v1895_v1  ;;  %2009 = vmatprep.subr.mxu0 %v1860_v15 }
 0x2ef   : > { %1937 = vmatpush1.msra.mxu1 %v1894_v16  ;;  %2010 = vmatpush1.msra.mxu0 %v1859_v17 }
 0x2f0   : > { %1938 = vmatprep.subr.mxu1 %v1893_v18  ;;  %2011 = vmatprep.subr.mxu0 %v1858_v19 }
 0x2f1   : > { %1939 = vmatpush1.msra.mxu1 %v1892_v20  ;;  %2012 = vmatpush1.msra.mxu0 %v1857_v21 }
 0x2f2   : > { %1940 = vmatprep.subr.mxu1 %v1891_v22  ;;  %2013 = vmatprep.subr.mxu0 %v1856_v23 }
 0x2f3   : > { %1941 = vmatpush1.msra.mxu1 %v1890_v24  ;;  %2014 = vmatpush1.msra.mxu0 %v1855_v25 }
 0x2f4   : > { %1942 = vmatprep.subr.mxu1 %v1889_v26  ;;  %2015 = vmatprep.subr.mxu0 %v1854_v27 }
 0x2f5   : > { %1943 = vmatpush1.msra.mxu1 %v1888_v28  ;;  %2016 = vmatpush1.msra.mxu0 %v1853_v29 }
 0x2f6   : > { %1944 = vmatprep.subr.mxu1 %v1887_v30  ;;  %2017 = vmatprep.subr.mxu0 %v1852_v31 }
 0x2f7   : > { %1945 = vmatpush1.msra.mxu1 %v1886_v33  ;;  %2018 = vmatpush1.msra.mxu0 %v1851_v34 }
 0x2f8   : > { %1946 = vmatprep.subr.mxu1 %v1885_v35  ;;  %2052 = vmatmul.mubr.f32.vlgmr.msra.gmra.mxu0 %v2997_v32 }
 0x2f9   : > { %1947 = vmatpush1.msra.mxu1 %v1884_v37  ;;  %1980 = vmatprep.mubr.f32.mxu1 %v2666_v0 }
 0x2fa   : > { %1981 = vmatmul.mubr.f32.vlgmr.msra.gmra.mxu1 %v3001_v36 }
 0x398   : > { %v1830_v38 = vpop.f32.mrf.mxu0 }
 0x39a   : > { %v1759_v39 = vpop.f32.mrf.mxu1  ;;  %v1832_v40 = vpop.f32.mrf.mxu0 }
 0x39b   : > { %v1831_v61 = vadd.f32 %v1830_v38, %v1759_v39 }
 0x39c   : > { %v1761_v41 = vpop.f32.mrf.mxu1 }
 0x39d   : > { %v1833_v3 = vadd.f32 %v1832_v40, %v1761_v41  ;;  %v1848_v5 = vadd.f32 %v1841_v62, %v1831_v61 }
 0x39f   : > { %v1849_v6 = vadd.f32 %v1845_v4, %v1833_v3  ;;  %v2073_v7 = vmax.f32 %v1848_v5, 0.0 }
 0x3a1   : > { %v2074_v8 = vmax.f32 %v1849_v6, 0.0  ;;  %v2085_v9 = vsub.f32 %v2073_v7, %v2997_v32 }
 0x3a3   : > { %v2088_v11 = vsub.f32 %v2074_v8, %v3001_v36 }
 0x3b8   : > { %v2053_v42 = vpop.f32.mrf.mxu0 }
 0x3ba   : > { %v1982_v52 = vpop.f32.mrf.mxu1  ;;  %v2055_v47 = vpop.f32.mrf.mxu0 }
 0x3bb   : > { %v2054_v44 = vadd.f32 %v2053_v42, %v1982_v52 }
 0x3bc   : > { %v1984_v48 = vpop.f32.mrf.mxu1 }
 0x3bd   : > { %v2071_v0 = vadd.f32 %v2064_v43, %v2054_v44  ;;  %v2056_v49 = vadd.f32 %v2055_v47, %v1984_v48 }
 0x3bf   : > { %v2075_v50 = vsub.f32 0.0, %v2071_v0  ;;  %v2072_v51 = vadd.f32 %v2068_v46, %v2056_v49 }
 0x3c1   : > { %v2077_v53 = vmul.f32 1.442695, %v2075_v50  ;;  %v2076_v54 = vsub.f32 0.0, %v2072_v51 }
 0x3c3   : > { %2404 = vpow2.f32 %v2077_v53  ;;  %v2079_v55 = vmul.f32 1.442695, %v2076_v54 }
 0x3c5   : > { %2406 = vpow2.f32 %v2079_v55 }
 0x3d0   : > { %v2405_v56 = vpop.eup %2404 }
 0x3d1   : > { %v2081_v58 = vadd.f32 1.0, %v2405_v56 }
 0x3d2   : > { %v2407_v59 = vpop.eup %2406 }
 0x3d3   : > { %2408 = vrcp.f32 %v2081_v58  ;;  %v2082_v2 = vadd.f32 1.0, %v2407_v59 }
 0x3d5   : > { %2410 = vrcp.f32 %v2082_v2 }
 0x3e0   : > { %v2409_v10 = vpop.eup %2408 }
 0x3e1   : > { %v2086_v60 = vmul.f32 %v2409_v10, %v2085_v9 }
 0x3e2   : > { %v2411_v12 = vpop.eup %2410 }
 0x3e3   : > { %v2087_v63 = vadd.f32 %v2086_v60, %v2997_v32  ;;  %v2089_v13 = vmul.f32 %v2411_v12, %v2088_v11 }
 0x3e5   : > { %v2090_v14 = vadd.f32 %v2089_v13, %v3001_v36  ;;  %2091 = vst [vmem:[%s442_s21] sm:$0xff] %v2087_v63 }
 0x3e7   : > { %2092 = vst [vmem:[%s442_s21 + $0x8] sm:$0xff] %v2090_v14 }
 0x3e8   : > { %2585 = shalt.err (!%p2582_p10)
}
 0x3e9   : > { %s2586_s22 = scalar_lea.hbm %s2106_s26, 256  ;;  %s2590_s17 = scalar_lea.hbm %s3067_s9, 512 }
 0x3ea   : > { %p2587_p3 = scmp.ne.s32.totalorder %s2106_s26, %s2586_s22  ;;  %p2591_p8 = scmp.lt.s32.totalorder %s2106_s26, %s3067_s9 }
 0x3eb   : > { %p2592_p12 = scmp.lt.s32.totalorder %s2590_s17, %s2586_s22 }
 0x3ec   : > { %p2588_p7 = pnand %p2587_p3, %p3098_p9 }
 0x3ed   : > { %p2593_p0 = por %p2592_p12, %p2591_p8 }
 0x3ee   : > { %p2589_p5 = pneg %p2588_p7 }
 0x3f0   : > { %p2594_p2 = pnand %p2593_p0, %p2589_p5 }
 0x3f2   : > { %2597 = shalt.err (!%p2594_p2)
}
 0x3f3   : > { %2316 = dma.vmem_to_hbm [thread:$0]  (%p3098_p9), %s2109_s2, 256, %s2106_s26, %s2094_s20  }
 0x3f4 PF: > { %s2120_s28 = sand.u32 1, %s2640_s30   ;;  %p3099_p11 = scmp.ne.s32.totalorder %s3088_s24, 0 }
 0x3f5   : > { %p3100_p13 = scmp.ge.s32.totalorder %s2652_s12, 2  ;;  %s2121_s29 = scalar_lea.sflag [#allocation4], %s2120_s28 }
 0x3f7   : > { %p2339_p1 = pnand %p3100_p13, %p3099_p11 }
 0x3f9   : > { %p2340_p4 = pneg %p2339_p1 }
 0x3fb   : > { %2635 = dma.done.wait (%p2340_p4), %s2121_s29, 256  }
 0x3fc   : > { %2637 = vsyncadd (%p2340_p4), %s2121_s29, 4294967040  ;;  %s3101_s7 = sld [smem:[#allocation20_spill]]  ;;  %p27_p6 = scmp.ge.s32.totalorder %s2804_s19, 4  }
 0x3fd   : > { %s3102_s11 = sld [smem:[#allocation21_spill]]  ;;  %s3103_s30 = smov %s2644_s10 }
 0x3fe   : > { %s3105_s12 = smov %s2804_s19  ;;  %29 = sbr.rel (!%p27_p6) target bundleno = 14 (0xe), region = 138 }
 0x402   : > { %s3104_s10 = smov %s3101_s7 }
 0x403   :  { %2126 = vsyncpa [#allocation3], 1 }
 0x404   :  { %2128 = vsyncpa [#allocation3 + $0x1], 1 }
 0x405   :  { %2129 = vsyncpa [#allocation6], 1 }
 0x406   :  { %2131 = vsyncpa [#allocation6 + $0x1], 1 }
 0x407   :  { %2132 = vsyncpa [#allocation9], 1 }
 0x408   :  { %2133 = vsyncpa [#allocation12], 1 }
 0x409   :  { %2134 = vsyncpa [#allocation4], 1 }
 0x40a   :  { %2136 = vsyncpa [#allocation4 + $0x1], 1 }

</bundles_post_ra>
